<compile_context>
chip_gen: v7x
topology: tpu7x:2x2x1
jax: 0.10.0
libtpu: 0.0.40
codegen_flags: <defaults>
</compile_context>

<pallas_src>
import functools

import jax
import jax.numpy as jnp
from jax.experimental import pallas as pl
from jax.experimental.pallas import tpu as pltpu


def _glstm_kernel(x_ref, eps_ref, wih_ref, whh_ref, b_ref, wrp_ref,
                  out_ref, *, seq, btile, hs):
    f32 = jnp.float32

    # ---- prologue: hoisted input projection, written straight into out_ref ----
    # out_ref doubles as the (x @ W_ih + b) staging buffer; each row block is
    # read exactly once in its timestep and then overwritten with [h|c|mu|std].
    out_ref[...] = (jnp.dot(x_ref[...], wih_ref[...],
                            preferred_element_type=f32)
                    + b_ref[...])                                  # (seq*btile, 4*hs)

    whh = whh_ref[...]
    wrp = wrp_ref[...]

    # loop-invariant lane mask for the g-gate block (hoisted: not CSE'd by JAX)
    lane = jax.lax.broadcasted_iota(jnp.int32, (btile, 4 * hs), 1)
    is_g = (lane >= 2 * hs) & (lane < 3 * hs)

    def step(t, carry):
        h_prev, c_prev = carry
        r0 = pl.multiple_of(t * btile, btile)        # btile is a multiple of 8

        # recurrent projection only — the x part was precomputed in the prologue
        gates = out_ref[pl.ds(r0, btile), :] + jnp.dot(
            h_prev, whh, preferred_element_type=f32)               # (btile, 4*hs)

        # single sigmoid pass over all 4*hs lanes; tanh(x) = 2*sigmoid(2x) - 1
        pre = jnp.where(is_g, gates + gates, gates)
        s = jax.nn.sigmoid(pre)
        act = jnp.where(is_g, s + s - 1.0, s)

        i_t = act[:, :hs]
        f_t = act[:, hs:2 * hs]
        g_t = act[:, 2 * hs:3 * hs]
        o_t = act[:, 3 * hs:]

        c_new = f_t * c_prev + i_t * g_t
        # NOTE: matches the PyTorch reference exactly — tanh of the *previous* cell state.
        pre_h = o_t * jnp.tanh(c_prev)

        # reparameterized hidden state: h_params = pre_h @ W_rp    (btile, 2*hs)
        h_params = jnp.dot(pre_h, wrp, preferred_element_type=f32)
        h_mu = jnp.clip(h_params[:, :hs], 1e-6, 1e6)
        h_std = jnp.maximum(jax.nn.softplus(h_params[:, hs:]), 1e-6)
        h_new = h_mu + eps_ref[pl.ds(r0, btile), :] * h_std

        # fused, lane-dense output slab: [h | c | mu | std] (4*hs lanes)
        out_ref[pl.ds(r0, btile), :] = jnp.concatenate(
            [h_new, c_new, h_mu, h_std], axis=-1)
        return (h_new, c_new)

    h0 = jnp.zeros((btile, hs), f32)
    c0 = jnp.zeros((btile, hs), f32)
    unroll = True if seq <= 32 else 8     # partial unroll for long sequences
    jax.lax.fori_loop(0, seq, step, (h0, c0), unroll=unroll)


def _num_tensorcores():
    """Best-effort TensorCore count (for megacore sharding). Safe default: 1."""
    try:
        info = pltpu.get_tpu_info()
        for attr in ("num_cores", "core_count", "num_tensorcores",
                     "tensorcore_count"):
            v = getattr(info, attr, None)
            if isinstance(v, int) and v > 0:
                return v
    except Exception:
        pass
    try:
        v = getattr(jax.devices()[0], "num_cores", None)
        if isinstance(v, int) and v > 0:
            return v
    except Exception:
        pass
    return 1


def _pick_batch_tile(bs_padded, num_cores):
    """Single-TC chips (v5e/v6e): never split (btile = bs).  Megacore (v7x):
    split into exactly TWO blocks of bs/2 (one per TensorCore), never more."""
    if num_cores >= 2 and bs_padded >= 16 and bs_padded % 16 == 0:
        return bs_padded // 2
    return bs_padded


def h_glstm_core(x, weight_ih, weight_hh, bias, h_reparam, eps):
    """x: (batch, seq, input_sz); eps: (seq, batch, hidden) pre-sampled N(0,1).
    Returns the PyTorch-equivalent outputs of h_GLSTMCore.forward (zero init states)."""
    bs, seq, D = x.shape
    HS = weight_hh.shape[0]
    G = 4 * HS
    f32 = jnp.float32
    assert HS % 8 == 0, "hidden size must be a multiple of 8 (sublane alignment)"

    # pad batch to a multiple of 8 so per-step row slices stay sublane aligned
    bs_pad = -(-bs // 8) * 8
    if bs_pad != bs:
        x = jnp.pad(x, ((0, bs_pad - bs), (0, 0), (0, 0)))
        eps = jnp.pad(eps, ((0, 0), (0, bs_pad - bs), (0, 0)))

    num_cores = _num_tensorcores()
    btile = _pick_batch_tile(bs_pad, num_cores)
    nb = bs_pad // btile

    # per batch-block layout with row index = t * btile + p (p = position in block)
    xb = (x.astype(f32)
            .reshape(nb, btile, seq, D)
            .transpose(0, 2, 1, 3)
            .reshape(nb, seq * btile, D))
    epsb = (eps.astype(f32)
              .reshape(seq, nb, btile, HS)
              .transpose(1, 0, 2, 3)
              .reshape(nb, seq * btile, HS))
    bias2d = bias.reshape(1, G).astype(f32)

    # explicit VMEM sizing: double-buffered x/eps/out blocks + resident weights
    blk_bytes = seq * btile * (D + HS + G) * 4
    wt_bytes = (D * G + HS * G + G + HS * 2 * HS) * 4
    vmem_limit = int(min(max(2 * blk_bytes + 2 * wt_bytes + (2 << 20), 16 << 20),
                         64 << 20))

    kernel = functools.partial(_glstm_kernel, seq=seq, btile=btile, hs=HS)
    const = lambda r, c: pl.BlockSpec((r, c), lambda b: (0, 0))

    out = pl.pallas_call(
        kernel,
        out_shape=jax.ShapeDtypeStruct((nb, seq * btile, G), f32),
        grid_spec=pltpu.PrefetchScalarGridSpec(
            num_scalar_prefetch=0,
            grid=(nb,),
            in_specs=[
                pl.BlockSpec((None, seq * btile, D), lambda b: (b, 0, 0)),   # x block
                pl.BlockSpec((None, seq * btile, HS), lambda b: (b, 0, 0)),  # eps block
                const(D, G),        # weight_ih (VMEM-resident)
                const(HS, G),       # weight_hh (VMEM-resident)
                const(1, G),        # bias
                const(HS, 2 * HS),  # h_reparameterize
            ],
            out_specs=pl.BlockSpec((None, seq * btile, G), lambda b: (b, 0, 0)),
        ),
        compiler_params=pltpu.CompilerParams(
            dimension_semantics=("parallel",),
            vmem_limit_bytes=vmem_limit),
    )(xb, epsb, weight_ih.astype(f32), weight_hh.astype(f32),
      bias2d, h_reparam.astype(f32))

    # un-fuse outputs + back to PyTorch (batch, seq, hidden) ordering, drop padding
    out = (out.reshape(nb, seq, btile, G)
              .transpose(0, 2, 1, 3)
              .reshape(bs_pad, seq, G))[:bs]
    hidden_seq = out[..., :HS]
    c_seq = out[..., HS:2 * HS]
    h_mus = out[..., 2 * HS:3 * HS]
    h_stds = out[..., 3 * HS:]
    h_t = hidden_seq[:, -1, :]
    c_t = c_seq[:, -1, :]
    return hidden_seq, c_seq, (h_mus, h_stds), (None, None), (h_t, c_t)


def _xavier_uniform(key, shape):
    fan_in, fan_out = shape
    limit = (6.0 / (fan_in + fan_out)) ** 0.5
    return jax.random.uniform(key, shape, jnp.float32, -limit, limit)


def _reference_jax(x, weight_ih, weight_hh, bias, h_reparam, eps):
    """Pure-JAX replica of the PyTorch forward (same pre-sampled eps)."""
    bs, seq, _ = x.shape
    HS = weight_hh.shape[0]
    h_t = jnp.zeros((bs, HS), jnp.float32)
    c_t = jnp.zeros((bs, HS), jnp.float32)
    hs_, cs_, mus, stds = [], [], [], []
    for t in range(seq):
        gates = x[:, t, :] @ weight_ih + h_t @ weight_hh + bias
        i_t = jax.nn.sigmoid(gates[:, :HS])
        f_t = jax.nn.sigmoid(gates[:, HS:2 * HS])
        g_t = jnp.tanh(gates[:, 2 * HS:3 * HS])
        o_t = jax.nn.sigmoid(gates[:, 3 * HS:])
        pre_c = f_t * c_t + i_t * g_t
        pre_h = o_t * jnp.tanh(c_t)
        params = pre_h @ h_reparam
        mu = jnp.clip(params[:, :HS], 1e-6, 1e6)
        std = jnp.maximum(jax.nn.softplus(params[:, HS:]), 1e-6)
        h_t = mu + eps[t] * std
        c_t = pre_c
        hs_.append(h_t); cs_.append(c_t); mus.append(mu); stds.append(std)
    stack = lambda lst: jnp.stack(lst, axis=1)
    return stack(hs_), stack(cs_), stack(mus), stack(stds)


if __name__ == "__main__":
    def _run_case(batch, seq, input_sz, hidden_sz, seed):
        key = jax.random.PRNGKey(seed)
        k_x, k_ih, k_hh, k_rp, k_eps, k_b = jax.random.split(key, 6)

        x = jax.random.normal(k_x, (batch, seq, input_sz), jnp.float32)
        weight_ih = _xavier_uniform(k_ih, (input_sz, hidden_sz * 4))
        weight_hh = _xavier_uniform(k_hh, (hidden_sz, hidden_sz * 4))
        # PyTorch init_weights zeroes the bias; use a small nonzero bias so the
        # fused-bias prologue path is actually exercised by the correctness check.
        bias = 0.1 * jax.random.normal(k_b, (hidden_sz * 4,), jnp.float32)
        h_reparam = _xavier_uniform(k_rp, (hidden_sz, hidden_sz * 2))
        scaling = jnp.concatenate(
            [jnp.ones((hidden_sz, hidden_sz)),
             jnp.ones((hidden_sz, hidden_sz)) * 1e-5], axis=1)
        h_reparam = h_reparam * scaling

        # reparameterization-trick noise, pre-sampled (time-major): (seq, batch, hidden)
        eps = jax.random.normal(k_eps, (seq, batch, hidden_sz), jnp.float32)

        outs = h_glstm_core(x, weight_ih, weight_hh, bias, h_reparam, eps)
        hidden_seq, c_seq, (h_mus, h_stds), _, (h_t, c_t) = jax.block_until_ready(outs)

        ref_h, ref_c, ref_mu, ref_std = _reference_jax(
            x, weight_ih, weight_hh, bias, h_reparam, eps)
        assert jnp.allclose(hidden_seq, ref_h, atol=1e-5, rtol=1e-5)
        assert jnp.allclose(c_seq, ref_c, atol=1e-5, rtol=1e-5)
        assert jnp.allclose(h_mus, ref_mu, atol=1e-5, rtol=1e-5)
        assert jnp.allclose(h_stds, ref_std, atol=1e-5, rtol=1e-5)
        assert hidden_seq.shape == (batch, seq, hidden_sz)
        assert h_t.shape == (batch, hidden_sz) and c_t.shape == (batch, hidden_sz)
        assert jnp.allclose(h_t, ref_h[:, -1, :], atol=1e-5, rtol=1e-5)
        assert jnp.allclose(c_t, ref_c[:, -1, :], atol=1e-5, rtol=1e-5)

    _run_case(batch=8, seq=8, input_sz=16, hidden_sz=32, seed=0)    # single block
    _run_case(batch=16, seq=8, input_sz=16, hidden_sz=32, seed=1)   # megacore split (v7x only)
    _run_case(batch=6, seq=8, input_sz=16, hidden_sz=32, seed=2)    # batch padding path
    _run_case(batch=8, seq=40, input_sz=16, hidden_sz=32, seed=3)   # partial-unroll path
    print("KERNEL_OK")
</pallas_src>

<mosaic_0001>
module attributes {stable_mosaic.version = 11 : i64} {
  func.func @_glstm_kernel(%arg0: i32, %arg1: memref<1x64x16xf32, #tpu.memory_space<vmem>>, %arg2: memref<1x64x32xf32, #tpu.memory_space<vmem>>, %arg3: memref<16x128xf32, #tpu.memory_space<vmem>>, %arg4: memref<32x128xf32, #tpu.memory_space<vmem>>, %arg5: memref<1x128xf32, #tpu.memory_space<vmem>>, %arg6: memref<32x64xf32, #tpu.memory_space<vmem>>, %arg7: memref<1x64x128xf32, #tpu.memory_space<vmem>>) attributes {dimension_semantics = [#tpu.dimension_semantics<parallel>], iteration_bounds = array<i64: 1>, scalar_prefetch = 0 : i64, scratch_operands = 0 : i64, tpu.core_type = #tpu.core_type<tc>, window_params = [{transform_indices = @transform_0, window_bounds = array<i64: 1, 64, 16>}, {transform_indices = @transform_1, window_bounds = array<i64: 1, 64, 32>}, {pipeline_mode = #tpu.pipeline_mode<synchronous>, transform_indices = @transform_2, window_bounds = array<i64: 16, 128>}, {pipeline_mode = #tpu.pipeline_mode<synchronous>, transform_indices = @transform_3, window_bounds = array<i64: 32, 128>}, {pipeline_mode = #tpu.pipeline_mode<synchronous>, transform_indices = @transform_4, window_bounds = array<i64: 1, 128>}, {pipeline_mode = #tpu.pipeline_mode<synchronous>, transform_indices = @transform_5, window_bounds = array<i64: 32, 64>}, {transform_indices = @transform_6, window_bounds = array<i64: 1, 64, 128>}]} {
    %c0 = arith.constant 0 : index
    %c0_0 = arith.constant 0 : index
    %c0_1 = arith.constant 0 : index
    %0 = vector.load %arg1[%c0, %c0_0, %c0_1] : memref<1x64x16xf32, #tpu.memory_space<vmem>>, vector<1x64x16xf32>
    %1 = vector.shape_cast %0 : vector<1x64x16xf32> to vector<64x16xf32>
    %c0_2 = arith.constant 0 : index
    %c0_3 = arith.constant 0 : index
    %2 = vector.load %arg3[%c0_2, %c0_3] : memref<16x128xf32, #tpu.memory_space<vmem>>, vector<16x128xf32>
    %cst = arith.constant dense<0.000000e+00> : vector<64x128xf32>
    %3 = tpu.matmul %1, %2, %cst {dimension_numbers = #tpu.dot_dimension_numbers<[1], [0], [0], [1], [0, 0, 1, 1], [], []>} : vector<64x16xf32>, vector<16x128xf32>, vector<64x128xf32> -> vector<64x128xf32>
    %c0_4 = arith.constant 0 : index
    %c0_5 = arith.constant 0 : index
    %4 = vector.load %arg5[%c0_4, %c0_5] : memref<1x128xf32, #tpu.memory_space<vmem>>, vector<1x128xf32>
    %5 = vector.broadcast %4 : vector<1x128xf32> to vector<64x128xf32>
    %6 = arith.addf %3, %5 : vector<64x128xf32>
    %c0_6 = arith.constant 0 : index
    %c0_7 = arith.constant 0 : index
    %c0_8 = arith.constant 0 : index
    %7 = vector.load %arg7[%c0_6, %c0_7, %c0_8] : memref<1x64x128xf32, #tpu.memory_space<vmem>>, vector<1x64x128xf32>
    %8 = vector.shape_cast %7 : vector<1x64x128xf32> to vector<64x128xf32>
    %9 = vector.shape_cast %6 : vector<64x128xf32> to vector<1x64x128xf32>
    tpu.vector_store %arg7[%c0_6, %c0_7, %c0_8], %9 {strides = array<i32>} : memref<1x64x128xf32, #tpu.memory_space<vmem>>, vector<1x64x128xf32>,
    %c0_9 = arith.constant 0 : index
    %c0_10 = arith.constant 0 : index
    %10 = vector.load %arg4[%c0_9, %c0_10] : memref<32x128xf32, #tpu.memory_space<vmem>>, vector<32x128xf32>
    %c0_11 = arith.constant 0 : index
    %c0_12 = arith.constant 0 : index
    %11 = vector.load %arg6[%c0_11, %c0_12] : memref<32x64xf32, #tpu.memory_space<vmem>>, vector<32x64xf32>
    %12 = tpu.iota {dimensions = array<i32: 1>} : vector<8x128xi32>
    %c64_i32 = arith.constant 64 : i32
    %13 = vector.broadcast %c64_i32 : i32 to vector<8x128xi32>
    %14 = arith.cmpi sge, %12, %13 : vector<8x128xi32>
    %c96_i32 = arith.constant 96 : i32
    %15 = vector.broadcast %c96_i32 : i32 to vector<8x128xi32>
    %16 = arith.cmpi slt, %12, %15 : vector<8x128xi32>
    %17 = arith.andi %14, %16 : vector<8x128xi1>
    %cst_13 = arith.constant 0.000000e+00 : f32
    %18 = vector.broadcast %cst_13 : f32 to vector<8x32xf32>
    %cst_14 = arith.constant 0.000000e+00 : f32
    %19 = vector.broadcast %cst_14 : f32 to vector<8x32xf32>
    %c0_i32 = arith.constant 0 : i32
    %c8_i32 = arith.constant 8 : i32
    %20 = arith.muli %c0_i32, %c8_i32 : i32
    %21 = tpu.assume_multiple %20, 8 : i32
    %c0_15 = arith.constant 0 : index
    %22 = arith.index_cast %21 : i32 to index
    %c0_16 = arith.constant 0 : index
    %23 = vector.load %arg7[%c0_15, %22, %c0_16] : memref<1x64x128xf32, #tpu.memory_space<vmem>>, vector<1x8x128xf32>
    %24 = vector.shape_cast %23 : vector<1x8x128xf32> to vector<8x128xf32>
    %cst_17 = arith.constant dense<0.000000e+00> : vector<8x128xf32>
    %25 = tpu.matmul %18, %10, %cst_17 {dimension_numbers = #tpu.dot_dimension_numbers<[1], [0], [0], [1], [0, 0, 1, 1], [], []>} : vector<8x32xf32>, vector<32x128xf32>, vector<8x128xf32> -> vector<8x128xf32>
    %26 = arith.addf %24, %25 : vector<8x128xf32>
    %27 = arith.addf %26, %26 : vector<8x128xf32>
    %28 = arith.select %17, %27, %26 : vector<8x128xi1>, vector<8x128xf32>
    %29 = arith.negf %28 : vector<8x128xf32>
    %30 = math.exp %29 : vector<8x128xf32>
    %cst_18 = arith.constant 1.000000e+00 : f32
    %31 = vector.broadcast %cst_18 : f32 to vector<8x128xf32>
    %32 = arith.addf %31, %30 : vector<8x128xf32>
    %33 = arith.divf %31, %32 : vector<8x128xf32>
    %34 = arith.addf %33, %33 : vector<8x128xf32>
    %cst_19 = arith.constant 1.000000e+00 : f32
    %35 = vector.broadcast %cst_19 : f32 to vector<8x128xf32>
    %36 = arith.subf %34, %35 : vector<8x128xf32>
    %37 = arith.select %17, %36, %33 : vector<8x128xi1>, vector<8x128xf32>
    %38 = vector.extract_strided_slice %37 {offsets = [0, 0], sizes = [8, 32], strides = [1, 1]} : vector<8x128xf32> to vector<8x32xf32>
    %39 = vector.extract_strided_slice %37 {offsets = [0, 32], sizes = [8, 32], strides = [1, 1]} : vector<8x128xf32> to vector<8x32xf32>
    %40 = vector.extract_strided_slice %37 {offsets = [0, 64], sizes = [8, 32], strides = [1, 1]} : vector<8x128xf32> to vector<8x32xf32>
    %41 = vector.extract_strided_slice %37 {offsets = [0, 96], sizes = [8, 32], strides = [1, 1]} : vector<8x128xf32> to vector<8x32xf32>
    %42 = arith.mulf %39, %19 : vector<8x32xf32>
    %43 = arith.mulf %38, %40 : vector<8x32xf32>
    %44 = arith.addf %42, %43 : vector<8x32xf32>
    %45 = math.tanh %19 : vector<8x32xf32>
    %46 = arith.mulf %41, %45 : vector<8x32xf32>
    %cst_20 = arith.constant dense<0.000000e+00> : vector<8x64xf32>
    %47 = tpu.matmul %46, %11, %cst_20 {dimension_numbers = #tpu.dot_dimension_numbers<[1], [0], [0], [1], [0, 0, 1, 1], [], []>} : vector<8x32xf32>, vector<32x64xf32>, vector<8x64xf32> -> vector<8x64xf32>
    %48 = vector.extract_strided_slice %47 {offsets = [0, 0], sizes = [8, 32], strides = [1, 1]} : vector<8x64xf32> to vector<8x32xf32>
    %cst_21 = arith.constant 9.99999997E-7 : f32
    %cst_22 = arith.constant 1.000000e+06 : f32
    %49 = vector.broadcast %cst_21 : f32 to vector<8x32xf32>
    %50 = arith.maximumf %49, %48 : vector<8x32xf32>
    %51 = vector.broadcast %cst_22 : f32 to vector<8x32xf32>
    %52 = arith.minimumf %51, %50 : vector<8x32xf32>
    %53 = vector.extract_strided_slice %47 {offsets = [0, 32], sizes = [8, 32], strides = [1, 1]} : vector<8x64xf32> to vector<8x32xf32>
    %cst_23 = arith.constant 0.000000e+00 : f32
    %54 = vector.broadcast %cst_23 : f32 to vector<8x32xf32>
    %55 = arith.maximumf %53, %54 : vector<8x32xf32>
    %56 = vector.broadcast %cst_23 : f32 to vector<8x32xf32>
    %57 = arith.subf %53, %56 : vector<8x32xf32>
    %58 = arith.cmpf one, %57, %57 : vector<8x32xf32>
    %59 = vector.broadcast %cst_23 : f32 to vector<8x32xf32>
    %60 = arith.addf %53, %59 : vector<8x32xf32>
    %61 = math.absf %57 : vector<8x32xf32>
    %cst_24 = arith.constant 0.000000e+00 : f32
    %62 = vector.broadcast %cst_24 : f32 to vector<8x32xf32>
    %63 = arith.subf %62, %61 : vector<8x32xf32>
    %64 = math.exp %63 : vector<8x32xf32>
    %65 = math.log1p %64 : vector<8x32xf32>
    %66 = arith.addf %55, %65 : vector<8x32xf32>
    %67 = arith.select %58, %60, %66 : vector<8x32xi1>, vector<8x32xf32>
    %cst_25 = arith.constant 9.99999997E-7 : f32
    %68 = vector.broadcast %cst_25 : f32 to vector<8x32xf32>
    %69 = arith.maximumf %67, %68 : vector<8x32xf32>
    %c0_26 = arith.constant 0 : index
    %70 = arith.index_cast %21 : i32 to index
    %c0_27 = arith.constant 0 : index
    %71 = vector.load %arg2[%c0_26, %70, %c0_27] : memref<1x64x32xf32, #tpu.memory_space<vmem>>, vector<1x8x32xf32>
    %72 = vector.shape_cast %71 : vector<1x8x32xf32> to vector<8x32xf32>
    %73 = arith.mulf %72, %69 : vector<8x32xf32>
    %74 = arith.addf %52, %73 : vector<8x32xf32>
    %75 = tpu.concatenate %74, %44, %52, %69 in 1 : vector<8x32xf32>, vector<8x32xf32>, vector<8x32xf32>, vector<8x32xf32> -> vector<8x128xf32>
    %c0_28 = arith.constant 0 : index
    %76 = arith.index_cast %21 : i32 to index
    %c0_29 = arith.constant 0 : index
    %77 = vector.load %arg7[%c0_28, %76, %c0_29] : memref<1x64x128xf32, #tpu.memory_space<vmem>>, vector<1x8x128xf32>
    %78 = vector.shape_cast %77 : vector<1x8x128xf32> to vector<8x128xf32>
    %79 = vector.shape_cast %75 : vector<8x128xf32> to vector<1x8x128xf32>
    tpu.vector_store %arg7[%c0_28, %76, %c0_29], %79 {strides = array<i32>} : memref<1x64x128xf32, #tpu.memory_space<vmem>>, vector<1x8x128xf32>,
    %c1_i32 = arith.constant 1 : i32
    %c8_i32_30 = arith.constant 8 : i32
    %80 = arith.muli %c1_i32, %c8_i32_30 : i32
    %81 = tpu.assume_multiple %80, 8 : i32
    %c0_31 = arith.constant 0 : index
    %82 = arith.index_cast %81 : i32 to index
    %c0_32 = arith.constant 0 : index
    %83 = vector.load %arg7[%c0_31, %82, %c0_32] : memref<1x64x128xf32, #tpu.memory_space<vmem>>, vector<1x8x128xf32>
    %84 = vector.shape_cast %83 : vector<1x8x128xf32> to vector<8x128xf32>
    %cst_33 = arith.constant dense<0.000000e+00> : vector<8x128xf32>
    %85 = tpu.matmul %74, %10, %cst_33 {dimension_numbers = #tpu.dot_dimension_numbers<[1], [0], [0], [1], [0, 0, 1, 1], [], []>} : vector<8x32xf32>, vector<32x128xf32>, vector<8x128xf32> -> vector<8x128xf32>
    %86 = arith.addf %84, %85 : vector<8x128xf32>
    %87 = arith.addf %86, %86 : vector<8x128xf32>
    %88 = arith.select %17, %87, %86 : vector<8x128xi1>, vector<8x128xf32>
    %89 = arith.negf %88 : vector<8x128xf32>
    %90 = math.exp %89 : vector<8x128xf32>
    %cst_34 = arith.constant 1.000000e+00 : f32
    %91 = vector.broadcast %cst_34 : f32 to vector<8x128xf32>
    %92 = arith.addf %91, %90 : vector<8x128xf32>
    %93 = arith.divf %91, %92 : vector<8x128xf32>
    %94 = arith.addf %93, %93 : vector<8x128xf32>
    %cst_35 = arith.constant 1.000000e+00 : f32
    %95 = vector.broadcast %cst_35 : f32 to vector<8x128xf32>
    %96 = arith.subf %94, %95 : vector<8x128xf32>
    %97 = arith.select %17, %96, %93 : vector<8x128xi1>, vector<8x128xf32>
    %98 = vector.extract_strided_slice %97 {offsets = [0, 0], sizes = [8, 32], strides = [1, 1]} : vector<8x128xf32> to vector<8x32xf32>
    %99 = vector.extract_strided_slice %97 {offsets = [0, 32], sizes = [8, 32], strides = [1, 1]} : vector<8x128xf32> to vector<8x32xf32>
    %100 = vector.extract_strided_slice %97 {offsets = [0, 64], sizes = [8, 32], strides = [1, 1]} : vector<8x128xf32> to vector<8x32xf32>
    %101 = vector.extract_strided_slice %97 {offsets = [0, 96], sizes = [8, 32], strides = [1, 1]} : vector<8x128xf32> to vector<8x32xf32>
    %102 = arith.mulf %99, %44 : vector<8x32xf32>
    %103 = arith.mulf %98, %100 : vector<8x32xf32>
    %104 = arith.addf %102, %103 : vector<8x32xf32>
    %105 = math.tanh %44 : vector<8x32xf32>
    %106 = arith.mulf %101, %105 : vector<8x32xf32>
    %cst_36 = arith.constant dense<0.000000e+00> : vector<8x64xf32>
    %107 = tpu.matmul %106, %11, %cst_36 {dimension_numbers = #tpu.dot_dimension_numbers<[1], [0], [0], [1], [0, 0, 1, 1], [], []>} : vector<8x32xf32>, vector<32x64xf32>, vector<8x64xf32> -> vector<8x64xf32>
    %108 = vector.extract_strided_slice %107 {offsets = [0, 0], sizes = [8, 32], strides = [1, 1]} : vector<8x64xf32> to vector<8x32xf32>
    %cst_37 = arith.constant 9.99999997E-7 : f32
    %cst_38 = arith.constant 1.000000e+06 : f32
    %109 = vector.broadcast %cst_37 : f32 to vector<8x32xf32>
    %110 = arith.maximumf %109, %108 : vector<8x32xf32>
    %111 = vector.broadcast %cst_38 : f32 to vector<8x32xf32>
    %112 = arith.minimumf %111, %110 : vector<8x32xf32>
    %113 = vector.extract_strided_slice %107 {offsets = [0, 32], sizes = [8, 32], strides = [1, 1]} : vector<8x64xf32> to vector<8x32xf32>
    %cst_39 = arith.constant 0.000000e+00 : f32
    %114 = vector.broadcast %cst_39 : f32 to vector<8x32xf32>
    %115 = arith.maximumf %113, %114 : vector<8x32xf32>
    %116 = vector.broadcast %cst_39 : f32 to vector<8x32xf32>
    %117 = arith.subf %113, %116 : vector<8x32xf32>
    %118 = arith.cmpf one, %117, %117 : vector<8x32xf32>
    %119 = vector.broadcast %cst_39 : f32 to vector<8x32xf32>
    %120 = arith.addf %113, %119 : vector<8x32xf32>
    %121 = math.absf %117 : vector<8x32xf32>
    %cst_40 = arith.constant 0.000000e+00 : f32
    %122 = vector.broadcast %cst_40 : f32 to vector<8x32xf32>
    %123 = arith.subf %122, %121 : vector<8x32xf32>
    %124 = math.exp %123 : vector<8x32xf32>
    %125 = math.log1p %124 : vector<8x32xf32>
    %126 = arith.addf %115, %125 : vector<8x32xf32>
    %127 = arith.select %118, %120, %126 : vector<8x32xi1>, vector<8x32xf32>
    %cst_41 = arith.constant 9.99999997E-7 : f32
    %128 = vector.broadcast %cst_41 : f32 to vector<8x32xf32>
    %129 = arith.maximumf %127, %128 : vector<8x32xf32>
    %c0_42 = arith.constant 0 : index
    %130 = arith.index_cast %81 : i32 to index
    %c0_43 = arith.constant 0 : index
    %131 = vector.load %arg2[%c0_42, %130, %c0_43] : memref<1x64x32xf32, #tpu.memory_space<vmem>>, vector<1x8x32xf32>
    %132 = vector.shape_cast %131 : vector<1x8x32xf32> to vector<8x32xf32>
    %133 = arith.mulf %132, %129 : vector<8x32xf32>
    %134 = arith.addf %112, %133 : vector<8x32xf32>
    %135 = tpu.concatenate %134, %104, %112, %129 in 1 : vector<8x32xf32>, vector<8x32xf32>, vector<8x32xf32>, vector<8x32xf32> -> vector<8x128xf32>
    %c0_44 = arith.constant 0 : index
    %136 = arith.index_cast %81 : i32 to index
    %c0_45 = arith.constant 0 : index
    %137 = vector.load %arg7[%c0_44, %136, %c0_45] : memref<1x64x128xf32, #tpu.memory_space<vmem>>, vector<1x8x128xf32>
    %138 = vector.shape_cast %137 : vector<1x8x128xf32> to vector<8x128xf32>
    %139 = vector.shape_cast %135 : vector<8x128xf32> to vector<1x8x128xf32>
    tpu.vector_store %arg7[%c0_44, %136, %c0_45], %139 {strides = array<i32>} : memref<1x64x128xf32, #tpu.memory_space<vmem>>, vector<1x8x128xf32>,
    %c2_i32 = arith.constant 2 : i32
    %c8_i32_46 = arith.constant 8 : i32
    %140 = arith.muli %c2_i32, %c8_i32_46 : i32
    %141 = tpu.assume_multiple %140, 8 : i32
    %c0_47 = arith.constant 0 : index
    %142 = arith.index_cast %141 : i32 to index
    %c0_48 = arith.constant 0 : index
    %143 = vector.load %arg7[%c0_47, %142, %c0_48] : memref<1x64x128xf32, #tpu.memory_space<vmem>>, vector<1x8x128xf32>
    %144 = vector.shape_cast %143 : vector<1x8x128xf32> to vector<8x128xf32>
    %cst_49 = arith.constant dense<0.000000e+00> : vector<8x128xf32>
    %145 = tpu.matmul %134, %10, %cst_49 {dimension_numbers = #tpu.dot_dimension_numbers<[1], [0], [0], [1], [0, 0, 1, 1], [], []>} : vector<8x32xf32>, vector<32x128xf32>, vector<8x128xf32> -> vector<8x128xf32>
    %146 = arith.addf %144, %145 : vector<8x128xf32>
    %147 = arith.addf %146, %146 : vector<8x128xf32>
    %148 = arith.select %17, %147, %146 : vector<8x128xi1>, vector<8x128xf32>
    %149 = arith.negf %148 : vector<8x128xf32>
    %150 = math.exp %149 : vector<8x128xf32>
    %cst_50 = arith.constant 1.000000e+00 : f32
    %151 = vector.broadcast %cst_50 : f32 to vector<8x128xf32>
    %152 = arith.addf %151, %150 : vector<8x128xf32>
    %153 = arith.divf %151, %152 : vector<8x128xf32>
    %154 = arith.addf %153, %153 : vector<8x128xf32>
    %cst_51 = arith.constant 1.000000e+00 : f32
    %155 = vector.broadcast %cst_51 : f32 to vector<8x128xf32>
    %156 = arith.subf %154, %155 : vector<8x128xf32>
    %157 = arith.select %17, %156, %153 : vector<8x128xi1>, vector<8x128xf32>
    %158 = vector.extract_strided_slice %157 {offsets = [0, 0], sizes = [8, 32], strides = [1, 1]} : vector<8x128xf32> to vector<8x32xf32>
    %159 = vector.extract_strided_slice %157 {offsets = [0, 32], sizes = [8, 32], strides = [1, 1]} : vector<8x128xf32> to vector<8x32xf32>
    %160 = vector.extract_strided_slice %157 {offsets = [0, 64], sizes = [8, 32], strides = [1, 1]} : vector<8x128xf32> to vector<8x32xf32>
    %161 = vector.extract_strided_slice %157 {offsets = [0, 96], sizes = [8, 32], strides = [1, 1]} : vector<8x128xf32> to vector<8x32xf32>
    %162 = arith.mulf %159, %104 : vector<8x32xf32>
    %163 = arith.mulf %158, %160 : vector<8x32xf32>
    %164 = arith.addf %162, %163 : vector<8x32xf32>
    %165 = math.tanh %104 : vector<8x32xf32>
    %166 = arith.mulf %161, %165 : vector<8x32xf32>
    %cst_52 = arith.constant dense<0.000000e+00> : vector<8x64xf32>
    %167 = tpu.matmul %166, %11, %cst_52 {dimension_numbers = #tpu.dot_dimension_numbers<[1], [0], [0], [1], [0, 0, 1, 1], [], []>} : vector<8x32xf32>, vector<32x64xf32>, vector<8x64xf32> -> vector<8x64xf32>
    %168 = vector.extract_strided_slice %167 {offsets = [0, 0], sizes = [8, 32], strides = [1, 1]} : vector<8x64xf32> to vector<8x32xf32>
    %cst_53 = arith.constant 9.99999997E-7 : f32
    %cst_54 = arith.constant 1.000000e+06 : f32
    %169 = vector.broadcast %cst_53 : f32 to vector<8x32xf32>
    %170 = arith.maximumf %169, %168 : vector<8x32xf32>
    %171 = vector.broadcast %cst_54 : f32 to vector<8x32xf32>
    %172 = arith.minimumf %171, %170 : vector<8x32xf32>
    %173 = vector.extract_strided_slice %167 {offsets = [0, 32], sizes = [8, 32], strides = [1, 1]} : vector<8x64xf32> to vector<8x32xf32>
    %cst_55 = arith.constant 0.000000e+00 : f32
    %174 = vector.broadcast %cst_55 : f32 to vector<8x32xf32>
    %175 = arith.maximumf %173, %174 : vector<8x32xf32>
    %176 = vector.broadcast %cst_55 : f32 to vector<8x32xf32>
    %177 = arith.subf %173, %176 : vector<8x32xf32>
    %178 = arith.cmpf one, %177, %177 : vector<8x32xf32>
    %179 = vector.broadcast %cst_55 : f32 to vector<8x32xf32>
    %180 = arith.addf %173, %179 : vector<8x32xf32>
    %181 = math.absf %177 : vector<8x32xf32>
    %cst_56 = arith.constant 0.000000e+00 : f32
    %182 = vector.broadcast %cst_56 : f32 to vector<8x32xf32>
    %183 = arith.subf %182, %181 : vector<8x32xf32>
    %184 = math.exp %183 : vector<8x32xf32>
    %185 = math.log1p %184 : vector<8x32xf32>
    %186 = arith.addf %175, %185 : vector<8x32xf32>
    %187 = arith.select %178, %180, %186 : vector<8x32xi1>, vector<8x32xf32>
    %cst_57 = arith.constant 9.99999997E-7 : f32
    %188 = vector.broadcast %cst_57 : f32 to vector<8x32xf32>
    %189 = arith.maximumf %187, %188 : vector<8x32xf32>
    %c0_58 = arith.constant 0 : index
    %190 = arith.index_cast %141 : i32 to index
    %c0_59 = arith.constant 0 : index
    %191 = vector.load %arg2[%c0_58, %190, %c0_59] : memref<1x64x32xf32, #tpu.memory_space<vmem>>, vector<1x8x32xf32>
    %192 = vector.shape_cast %191 : vector<1x8x32xf32> to vector<8x32xf32>
    %193 = arith.mulf %192, %189 : vector<8x32xf32>
    %194 = arith.addf %172, %193 : vector<8x32xf32>
    %195 = tpu.concatenate %194, %164, %172, %189 in 1 : vector<8x32xf32>, vector<8x32xf32>, vector<8x32xf32>, vector<8x32xf32> -> vector<8x128xf32>
    %c0_60 = arith.constant 0 : index
    %196 = arith.index_cast %141 : i32 to index
    %c0_61 = arith.constant 0 : index
    %197 = vector.load %arg7[%c0_60, %196, %c0_61] : memref<1x64x128xf32, #tpu.memory_space<vmem>>, vector<1x8x128xf32>
    %198 = vector.shape_cast %197 : vector<1x8x128xf32> to vector<8x128xf32>
    %199 = vector.shape_cast %195 : vector<8x128xf32> to vector<1x8x128xf32>
    tpu.vector_store %arg7[%c0_60, %196, %c0_61], %199 {strides = array<i32>} : memref<1x64x128xf32, #tpu.memory_space<vmem>>, vector<1x8x128xf32>,
    %c3_i32 = arith.constant 3 : i32
    %c8_i32_62 = arith.constant 8 : i32
    %200 = arith.muli %c3_i32, %c8_i32_62 : i32
    %201 = tpu.assume_multiple %200, 8 : i32
    %c0_63 = arith.constant 0 : index
    %202 = arith.index_cast %201 : i32 to index
    %c0_64 = arith.constant 0 : index
    %203 = vector.load %arg7[%c0_63, %202, %c0_64] : memref<1x64x128xf32, #tpu.memory_space<vmem>>, vector<1x8x128xf32>
    %204 = vector.shape_cast %203 : vector<1x8x128xf32> to vector<8x128xf32>
    %cst_65 = arith.constant dense<0.000000e+00> : vector<8x128xf32>
    %205 = tpu.matmul %194, %10, %cst_65 {dimension_numbers = #tpu.dot_dimension_numbers<[1], [0], [0], [1], [0, 0, 1, 1], [], []>} : vector<8x32xf32>, vector<32x128xf32>, vector<8x128xf32> -> vector<8x128xf32>
    %206 = arith.addf %204, %205 : vector<8x128xf32>
    %207 = arith.addf %206, %206 : vector<8x128xf32>
    %208 = arith.select %17, %207, %206 : vector<8x128xi1>, vector<8x128xf32>
    %209 = arith.negf %208 : vector<8x128xf32>
    %210 = math.exp %209 : vector<8x128xf32>
    %cst_66 = arith.constant 1.000000e+00 : f32
    %211 = vector.broadcast %cst_66 : f32 to vector<8x128xf32>
    %212 = arith.addf %211, %210 : vector<8x128xf32>
    %213 = arith.divf %211, %212 : vector<8x128xf32>
    %214 = arith.addf %213, %213 : vector<8x128xf32>
    %cst_67 = arith.constant 1.000000e+00 : f32
    %215 = vector.broadcast %cst_67 : f32 to vector<8x128xf32>
    %216 = arith.subf %214, %215 : vector<8x128xf32>
    %217 = arith.select %17, %216, %213 : vector<8x128xi1>, vector<8x128xf32>
    %218 = vector.extract_strided_slice %217 {offsets = [0, 0], sizes = [8, 32], strides = [1, 1]} : vector<8x128xf32> to vector<8x32xf32>
    %219 = vector.extract_strided_slice %217 {offsets = [0, 32], sizes = [8, 32], strides = [1, 1]} : vector<8x128xf32> to vector<8x32xf32>
    %220 = vector.extract_strided_slice %217 {offsets = [0, 64], sizes = [8, 32], strides = [1, 1]} : vector<8x128xf32> to vector<8x32xf32>
    %221 = vector.extract_strided_slice %217 {offsets = [0, 96], sizes = [8, 32], strides = [1, 1]} : vector<8x128xf32> to vector<8x32xf32>
    %222 = arith.mulf %219, %164 : vector<8x32xf32>
    %223 = arith.mulf %218, %220 : vector<8x32xf32>
    %224 = arith.addf %222, %223 : vector<8x32xf32>
    %225 = math.tanh %164 : vector<8x32xf32>
    %226 = arith.mulf %221, %225 : vector<8x32xf32>
    %cst_68 = arith.constant dense<0.000000e+00> : vector<8x64xf32>
    %227 = tpu.matmul %226, %11, %cst_68 {dimension_numbers = #tpu.dot_dimension_numbers<[1], [0], [0], [1], [0, 0, 1, 1], [], []>} : vector<8x32xf32>, vector<32x64xf32>, vector<8x64xf32> -> vector<8x64xf32>
    %228 = vector.extract_strided_slice %227 {offsets = [0, 0], sizes = [8, 32], strides = [1, 1]} : vector<8x64xf32> to vector<8x32xf32>
    %cst_69 = arith.constant 9.99999997E-7 : f32
    %cst_70 = arith.constant 1.000000e+06 : f32
    %229 = vector.broadcast %cst_69 : f32 to vector<8x32xf32>
    %230 = arith.maximumf %229, %228 : vector<8x32xf32>
    %231 = vector.broadcast %cst_70 : f32 to vector<8x32xf32>
    %232 = arith.minimumf %231, %230 : vector<8x32xf32>
    %233 = vector.extract_strided_slice %227 {offsets = [0, 32], sizes = [8, 32], strides = [1, 1]} : vector<8x64xf32> to vector<8x32xf32>
    %cst_71 = arith.constant 0.000000e+00 : f32
    %234 = vector.broadcast %cst_71 : f32 to vector<8x32xf32>
    %235 = arith.maximumf %233, %234 : vector<8x32xf32>
    %236 = vector.broadcast %cst_71 : f32 to vector<8x32xf32>
    %237 = arith.subf %233, %236 : vector<8x32xf32>
    %238 = arith.cmpf one, %237, %237 : vector<8x32xf32>
    %239 = vector.broadcast %cst_71 : f32 to vector<8x32xf32>
    %240 = arith.addf %233, %239 : vector<8x32xf32>
    %241 = math.absf %237 : vector<8x32xf32>
    %cst_72 = arith.constant 0.000000e+00 : f32
    %242 = vector.broadcast %cst_72 : f32 to vector<8x32xf32>
    %243 = arith.subf %242, %241 : vector<8x32xf32>
    %244 = math.exp %243 : vector<8x32xf32>
    %245 = math.log1p %244 : vector<8x32xf32>
    %246 = arith.addf %235, %245 : vector<8x32xf32>
    %247 = arith.select %238, %240, %246 : vector<8x32xi1>, vector<8x32xf32>
    %cst_73 = arith.constant 9.99999997E-7 : f32
    %248 = vector.broadcast %cst_73 : f32 to vector<8x32xf32>
    %249 = arith.maximumf %247, %248 : vector<8x32xf32>
    %c0_74 = arith.constant 0 : index
    %250 = arith.index_cast %201 : i32 to index
    %c0_75 = arith.constant 0 : index
    %251 = vector.load %arg2[%c0_74, %250, %c0_75] : memref<1x64x32xf32, #tpu.memory_space<vmem>>, vector<1x8x32xf32>
    %252 = vector.shape_cast %251 : vector<1x8x32xf32> to vector<8x32xf32>
    %253 = arith.mulf %252, %249 : vector<8x32xf32>
    %254 = arith.addf %232, %253 : vector<8x32xf32>
    %255 = tpu.concatenate %254, %224, %232, %249 in 1 : vector<8x32xf32>, vector<8x32xf32>, vector<8x32xf32>, vector<8x32xf32> -> vector<8x128xf32>
    %c0_76 = arith.constant 0 : index
    %256 = arith.index_cast %201 : i32 to index
    %c0_77 = arith.constant 0 : index
    %257 = vector.load %arg7[%c0_76, %256, %c0_77] : memref<1x64x128xf32, #tpu.memory_space<vmem>>, vector<1x8x128xf32>
    %258 = vector.shape_cast %257 : vector<1x8x128xf32> to vector<8x128xf32>
    %259 = vector.shape_cast %255 : vector<8x128xf32> to vector<1x8x128xf32>
    tpu.vector_store %arg7[%c0_76, %256, %c0_77], %259 {strides = array<i32>} : memref<1x64x128xf32, #tpu.memory_space<vmem>>, vector<1x8x128xf32>,
    %c4_i32 = arith.constant 4 : i32
    %c8_i32_78 = arith.constant 8 : i32
    %260 = arith.muli %c4_i32, %c8_i32_78 : i32
    %261 = tpu.assume_multiple %260, 8 : i32
    %c0_79 = arith.constant 0 : index
    %262 = arith.index_cast %261 : i32 to index
    %c0_80 = arith.constant 0 : index
    %263 = vector.load %arg7[%c0_79, %262, %c0_80] : memref<1x64x128xf32, #tpu.memory_space<vmem>>, vector<1x8x128xf32>
    %264 = vector.shape_cast %263 : vector<1x8x128xf32> to vector<8x128xf32>
    %cst_81 = arith.constant dense<0.000000e+00> : vector<8x128xf32>
    %265 = tpu.matmul %254, %10, %cst_81 {dimension_numbers = #tpu.dot_dimension_numbers<[1], [0], [0], [1], [0, 0, 1, 1], [], []>} : vector<8x32xf32>, vector<32x128xf32>, vector<8x128xf32> -> vector<8x128xf32>
    %266 = arith.addf %264, %265 : vector<8x128xf32>
    %267 = arith.addf %266, %266 : vector<8x128xf32>
    %268 = arith.select %17, %267, %266 : vector<8x128xi1>, vector<8x128xf32>
    %269 = arith.negf %268 : vector<8x128xf32>
    %270 = math.exp %269 : vector<8x128xf32>
    %cst_82 = arith.constant 1.000000e+00 : f32
    %271 = vector.broadcast %cst_82 : f32 to vector<8x128xf32>
    %272 = arith.addf %271, %270 : vector<8x128xf32>
    %273 = arith.divf %271, %272 : vector<8x128xf32>
    %274 = arith.addf %273, %273 : vector<8x128xf32>
    %cst_83 = arith.constant 1.000000e+00 : f32
    %275 = vector.broadcast %cst_83 : f32 to vector<8x128xf32>
    %276 = arith.subf %274, %275 : vector<8x128xf32>
    %277 = arith.select %17, %276, %273 : vector<8x128xi1>, vector<8x128xf32>
    %278 = vector.extract_strided_slice %277 {offsets = [0, 0], sizes = [8, 32], strides = [1, 1]} : vector<8x128xf32> to vector<8x32xf32>
    %279 = vector.extract_strided_slice %277 {offsets = [0, 32], sizes = [8, 32], strides = [1, 1]} : vector<8x128xf32> to vector<8x32xf32>
    %280 = vector.extract_strided_slice %277 {offsets = [0, 64], sizes = [8, 32], strides = [1, 1]} : vector<8x128xf32> to vector<8x32xf32>
    %281 = vector.extract_strided_slice %277 {offsets = [0, 96], sizes = [8, 32], strides = [1, 1]} : vector<8x128xf32> to vector<8x32xf32>
    %282 = arith.mulf %279, %224 : vector<8x32xf32>
    %283 = arith.mulf %278, %280 : vector<8x32xf32>
    %284 = arith.addf %282, %283 : vector<8x32xf32>
    %285 = math.tanh %224 : vector<8x32xf32>
    %286 = arith.mulf %281, %285 : vector<8x32xf32>
    %cst_84 = arith.constant dense<0.000000e+00> : vector<8x64xf32>
    %287 = tpu.matmul %286, %11, %cst_84 {dimension_numbers = #tpu.dot_dimension_numbers<[1], [0], [0], [1], [0, 0, 1, 1], [], []>} : vector<8x32xf32>, vector<32x64xf32>, vector<8x64xf32> -> vector<8x64xf32>
    %288 = vector.extract_strided_slice %287 {offsets = [0, 0], sizes = [8, 32], strides = [1, 1]} : vector<8x64xf32> to vector<8x32xf32>
    %cst_85 = arith.constant 9.99999997E-7 : f32
    %cst_86 = arith.constant 1.000000e+06 : f32
    %289 = vector.broadcast %cst_85 : f32 to vector<8x32xf32>
    %290 = arith.maximumf %289, %288 : vector<8x32xf32>
    %291 = vector.broadcast %cst_86 : f32 to vector<8x32xf32>
    %292 = arith.minimumf %291, %290 : vector<8x32xf32>
    %293 = vector.extract_strided_slice %287 {offsets = [0, 32], sizes = [8, 32], strides = [1, 1]} : vector<8x64xf32> to vector<8x32xf32>
    %cst_87 = arith.constant 0.000000e+00 : f32
    %294 = vector.broadcast %cst_87 : f32 to vector<8x32xf32>
    %295 = arith.maximumf %293, %294 : vector<8x32xf32>
    %296 = vector.broadcast %cst_87 : f32 to vector<8x32xf32>
    %297 = arith.subf %293, %296 : vector<8x32xf32>
    %298 = arith.cmpf one, %297, %297 : vector<8x32xf32>
    %299 = vector.broadcast %cst_87 : f32 to vector<8x32xf32>
    %300 = arith.addf %293, %299 : vector<8x32xf32>
    %301 = math.absf %297 : vector<8x32xf32>
    %cst_88 = arith.constant 0.000000e+00 : f32
    %302 = vector.broadcast %cst_88 : f32 to vector<8x32xf32>
    %303 = arith.subf %302, %301 : vector<8x32xf32>
    %304 = math.exp %303 : vector<8x32xf32>
    %305 = math.log1p %304 : vector<8x32xf32>
    %306 = arith.addf %295, %305 : vector<8x32xf32>
    %307 = arith.select %298, %300, %306 : vector<8x32xi1>, vector<8x32xf32>
    %cst_89 = arith.constant 9.99999997E-7 : f32
    %308 = vector.broadcast %cst_89 : f32 to vector<8x32xf32>
    %309 = arith.maximumf %307, %308 : vector<8x32xf32>
    %c0_90 = arith.constant 0 : index
    %310 = arith.index_cast %261 : i32 to index
    %c0_91 = arith.constant 0 : index
    %311 = vector.load %arg2[%c0_90, %310, %c0_91] : memref<1x64x32xf32, #tpu.memory_space<vmem>>, vector<1x8x32xf32>
    %312 = vector.shape_cast %311 : vector<1x8x32xf32> to vector<8x32xf32>
    %313 = arith.mulf %312, %309 : vector<8x32xf32>
    %314 = arith.addf %292, %313 : vector<8x32xf32>
    %315 = tpu.concatenate %314, %284, %292, %309 in 1 : vector<8x32xf32>, vector<8x32xf32>, vector<8x32xf32>, vector<8x32xf32> -> vector<8x128xf32>
    %c0_92 = arith.constant 0 : index
    %316 = arith.index_cast %261 : i32 to index
    %c0_93 = arith.constant 0 : index
    %317 = vector.load %arg7[%c0_92, %316, %c0_93] : memref<1x64x128xf32, #tpu.memory_space<vmem>>, vector<1x8x128xf32>
    %318 = vector.shape_cast %317 : vector<1x8x128xf32> to vector<8x128xf32>
    %319 = vector.shape_cast %315 : vector<8x128xf32> to vector<1x8x128xf32>
    tpu.vector_store %arg7[%c0_92, %316, %c0_93], %319 {strides = array<i32>} : memref<1x64x128xf32, #tpu.memory_space<vmem>>, vector<1x8x128xf32>,
    %c5_i32 = arith.constant 5 : i32
    %c8_i32_94 = arith.constant 8 : i32
    %320 = arith.muli %c5_i32, %c8_i32_94 : i32
    %321 = tpu.assume_multiple %320, 8 : i32
    %c0_95 = arith.constant 0 : index
    %322 = arith.index_cast %321 : i32 to index
    %c0_96 = arith.constant 0 : index
    %323 = vector.load %arg7[%c0_95, %322, %c0_96] : memref<1x64x128xf32, #tpu.memory_space<vmem>>, vector<1x8x128xf32>
    %324 = vector.shape_cast %323 : vector<1x8x128xf32> to vector<8x128xf32>
    %cst_97 = arith.constant dense<0.000000e+00> : vector<8x128xf32>
    %325 = tpu.matmul %314, %10, %cst_97 {dimension_numbers = #tpu.dot_dimension_numbers<[1], [0], [0], [1], [0, 0, 1, 1], [], []>} : vector<8x32xf32>, vector<32x128xf32>, vector<8x128xf32> -> vector<8x128xf32>
    %326 = arith.addf %324, %325 : vector<8x128xf32>
    %327 = arith.addf %326, %326 : vector<8x128xf32>
    %328 = arith.select %17, %327, %326 : vector<8x128xi1>, vector<8x128xf32>
    %329 = arith.negf %328 : vector<8x128xf32>
    %330 = math.exp %329 : vector<8x128xf32>
    %cst_98 = arith.constant 1.000000e+00 : f32
    %331 = vector.broadcast %cst_98 : f32 to vector<8x128xf32>
    %332 = arith.addf %331, %330 : vector<8x128xf32>
    %333 = arith.divf %331, %332 : vector<8x128xf32>
    %334 = arith.addf %333, %333 : vector<8x128xf32>
    %cst_99 = arith.constant 1.000000e+00 : f32
    %335 = vector.broadcast %cst_99 : f32 to vector<8x128xf32>
    %336 = arith.subf %334, %335 : vector<8x128xf32>
    %337 = arith.select %17, %336, %333 : vector<8x128xi1>, vector<8x128xf32>
    %338 = vector.extract_strided_slice %337 {offsets = [0, 0], sizes = [8, 32], strides = [1, 1]} : vector<8x128xf32> to vector<8x32xf32>
    %339 = vector.extract_strided_slice %337 {offsets = [0, 32], sizes = [8, 32], strides = [1, 1]} : vector<8x128xf32> to vector<8x32xf32>
    %340 = vector.extract_strided_slice %337 {offsets = [0, 64], sizes = [8, 32], strides = [1, 1]} : vector<8x128xf32> to vector<8x32xf32>
    %341 = vector.extract_strided_slice %337 {offsets = [0, 96], sizes = [8, 32], strides = [1, 1]} : vector<8x128xf32> to vector<8x32xf32>
    %342 = arith.mulf %339, %284 : vector<8x32xf32>
    %343 = arith.mulf %338, %340 : vector<8x32xf32>
    %344 = arith.addf %342, %343 : vector<8x32xf32>
    %345 = math.tanh %284 : vector<8x32xf32>
    %346 = arith.mulf %341, %345 : vector<8x32xf32>
    %cst_100 = arith.constant dense<0.000000e+00> : vector<8x64xf32>
    %347 = tpu.matmul %346, %11, %cst_100 {dimension_numbers = #tpu.dot_dimension_numbers<[1], [0], [0], [1], [0, 0, 1, 1], [], []>} : vector<8x32xf32>, vector<32x64xf32>, vector<8x64xf32> -> vector<8x64xf32>
    %348 = vector.extract_strided_slice %347 {offsets = [0, 0], sizes = [8, 32], strides = [1, 1]} : vector<8x64xf32> to vector<8x32xf32>
    %cst_101 = arith.constant 9.99999997E-7 : f32
    %cst_102 = arith.constant 1.000000e+06 : f32
    %349 = vector.broadcast %cst_101 : f32 to vector<8x32xf32>
    %350 = arith.maximumf %349, %348 : vector<8x32xf32>
    %351 = vector.broadcast %cst_102 : f32 to vector<8x32xf32>
    %352 = arith.minimumf %351, %350 : vector<8x32xf32>
    %353 = vector.extract_strided_slice %347 {offsets = [0, 32], sizes = [8, 32], strides = [1, 1]} : vector<8x64xf32> to vector<8x32xf32>
    %cst_103 = arith.constant 0.000000e+00 : f32
    %354 = vector.broadcast %cst_103 : f32 to vector<8x32xf32>
    %355 = arith.maximumf %353, %354 : vector<8x32xf32>
    %356 = vector.broadcast %cst_103 : f32 to vector<8x32xf32>
    %357 = arith.subf %353, %356 : vector<8x32xf32>
    %358 = arith.cmpf one, %357, %357 : vector<8x32xf32>
    %359 = vector.broadcast %cst_103 : f32 to vector<8x32xf32>
    %360 = arith.addf %353, %359 : vector<8x32xf32>
    %361 = math.absf %357 : vector<8x32xf32>
    %cst_104 = arith.constant 0.000000e+00 : f32
    %362 = vector.broadcast %cst_104 : f32 to vector<8x32xf32>
    %363 = arith.subf %362, %361 : vector<8x32xf32>
    %364 = math.exp %363 : vector<8x32xf32>
    %365 = math.log1p %364 : vector<8x32xf32>
    %366 = arith.addf %355, %365 : vector<8x32xf32>
    %367 = arith.select %358, %360, %366 : vector<8x32xi1>, vector<8x32xf32>
    %cst_105 = arith.constant 9.99999997E-7 : f32
    %368 = vector.broadcast %cst_105 : f32 to vector<8x32xf32>
    %369 = arith.maximumf %367, %368 : vector<8x32xf32>
    %c0_106 = arith.constant 0 : index
    %370 = arith.index_cast %321 : i32 to index
    %c0_107 = arith.constant 0 : index
    %371 = vector.load %arg2[%c0_106, %370, %c0_107] : memref<1x64x32xf32, #tpu.memory_space<vmem>>, vector<1x8x32xf32>
    %372 = vector.shape_cast %371 : vector<1x8x32xf32> to vector<8x32xf32>
    %373 = arith.mulf %372, %369 : vector<8x32xf32>
    %374 = arith.addf %352, %373 : vector<8x32xf32>
    %375 = tpu.concatenate %374, %344, %352, %369 in 1 : vector<8x32xf32>, vector<8x32xf32>, vector<8x32xf32>, vector<8x32xf32> -> vector<8x128xf32>
    %c0_108 = arith.constant 0 : index
    %376 = arith.index_cast %321 : i32 to index
    %c0_109 = arith.constant 0 : index
    %377 = vector.load %arg7[%c0_108, %376, %c0_109] : memref<1x64x128xf32, #tpu.memory_space<vmem>>, vector<1x8x128xf32>
    %378 = vector.shape_cast %377 : vector<1x8x128xf32> to vector<8x128xf32>
    %379 = vector.shape_cast %375 : vector<8x128xf32> to vector<1x8x128xf32>
    tpu.vector_store %arg7[%c0_108, %376, %c0_109], %379 {strides = array<i32>} : memref<1x64x128xf32, #tpu.memory_space<vmem>>, vector<1x8x128xf32>,
    %c6_i32 = arith.constant 6 : i32
    %c8_i32_110 = arith.constant 8 : i32
    %380 = arith.muli %c6_i32, %c8_i32_110 : i32
    %381 = tpu.assume_multiple %380, 8 : i32
    %c0_111 = arith.constant 0 : index
    %382 = arith.index_cast %381 : i32 to index
    %c0_112 = arith.constant 0 : index
    %383 = vector.load %arg7[%c0_111, %382, %c0_112] : memref<1x64x128xf32, #tpu.memory_space<vmem>>, vector<1x8x128xf32>
    %384 = vector.shape_cast %383 : vector<1x8x128xf32> to vector<8x128xf32>
    %cst_113 = arith.constant dense<0.000000e+00> : vector<8x128xf32>
    %385 = tpu.matmul %374, %10, %cst_113 {dimension_numbers = #tpu.dot_dimension_numbers<[1], [0], [0], [1], [0, 0, 1, 1], [], []>} : vector<8x32xf32>, vector<32x128xf32>, vector<8x128xf32> -> vector<8x128xf32>
    %386 = arith.addf %384, %385 : vector<8x128xf32>
    %387 = arith.addf %386, %386 : vector<8x128xf32>
    %388 = arith.select %17, %387, %386 : vector<8x128xi1>, vector<8x128xf32>
    %389 = arith.negf %388 : vector<8x128xf32>
    %390 = math.exp %389 : vector<8x128xf32>
    %cst_114 = arith.constant 1.000000e+00 : f32
    %391 = vector.broadcast %cst_114 : f32 to vector<8x128xf32>
    %392 = arith.addf %391, %390 : vector<8x128xf32>
    %393 = arith.divf %391, %392 : vector<8x128xf32>
    %394 = arith.addf %393, %393 : vector<8x128xf32>
    %cst_115 = arith.constant 1.000000e+00 : f32
    %395 = vector.broadcast %cst_115 : f32 to vector<8x128xf32>
    %396 = arith.subf %394, %395 : vector<8x128xf32>
    %397 = arith.select %17, %396, %393 : vector<8x128xi1>, vector<8x128xf32>
    %398 = vector.extract_strided_slice %397 {offsets = [0, 0], sizes = [8, 32], strides = [1, 1]} : vector<8x128xf32> to vector<8x32xf32>
    %399 = vector.extract_strided_slice %397 {offsets = [0, 32], sizes = [8, 32], strides = [1, 1]} : vector<8x128xf32> to vector<8x32xf32>
    %400 = vector.extract_strided_slice %397 {offsets = [0, 64], sizes = [8, 32], strides = [1, 1]} : vector<8x128xf32> to vector<8x32xf32>
    %401 = vector.extract_strided_slice %397 {offsets = [0, 96], sizes = [8, 32], strides = [1, 1]} : vector<8x128xf32> to vector<8x32xf32>
    %402 = arith.mulf %399, %344 : vector<8x32xf32>
    %403 = arith.mulf %398, %400 : vector<8x32xf32>
    %404 = arith.addf %402, %403 : vector<8x32xf32>
    %405 = math.tanh %344 : vector<8x32xf32>
    %406 = arith.mulf %401, %405 : vector<8x32xf32>
    %cst_116 = arith.constant dense<0.000000e+00> : vector<8x64xf32>
    %407 = tpu.matmul %406, %11, %cst_116 {dimension_numbers = #tpu.dot_dimension_numbers<[1], [0], [0], [1], [0, 0, 1, 1], [], []>} : vector<8x32xf32>, vector<32x64xf32>, vector<8x64xf32> -> vector<8x64xf32>
    %408 = vector.extract_strided_slice %407 {offsets = [0, 0], sizes = [8, 32], strides = [1, 1]} : vector<8x64xf32> to vector<8x32xf32>
    %cst_117 = arith.constant 9.99999997E-7 : f32
    %cst_118 = arith.constant 1.000000e+06 : f32
    %409 = vector.broadcast %cst_117 : f32 to vector<8x32xf32>
    %410 = arith.maximumf %409, %408 : vector<8x32xf32>
    %411 = vector.broadcast %cst_118 : f32 to vector<8x32xf32>
    %412 = arith.minimumf %411, %410 : vector<8x32xf32>
    %413 = vector.extract_strided_slice %407 {offsets = [0, 32], sizes = [8, 32], strides = [1, 1]} : vector<8x64xf32> to vector<8x32xf32>
    %cst_119 = arith.constant 0.000000e+00 : f32
    %414 = vector.broadcast %cst_119 : f32 to vector<8x32xf32>
    %415 = arith.maximumf %413, %414 : vector<8x32xf32>
    %416 = vector.broadcast %cst_119 : f32 to vector<8x32xf32>
    %417 = arith.subf %413, %416 : vector<8x32xf32>
    %418 = arith.cmpf one, %417, %417 : vector<8x32xf32>
    %419 = vector.broadcast %cst_119 : f32 to vector<8x32xf32>
    %420 = arith.addf %413, %419 : vector<8x32xf32>
    %421 = math.absf %417 : vector<8x32xf32>
    %cst_120 = arith.constant 0.000000e+00 : f32
    %422 = vector.broadcast %cst_120 : f32 to vector<8x32xf32>
    %423 = arith.subf %422, %421 : vector<8x32xf32>
    %424 = math.exp %423 : vector<8x32xf32>
    %425 = math.log1p %424 : vector<8x32xf32>
    %426 = arith.addf %415, %425 : vector<8x32xf32>
    %427 = arith.select %418, %420, %426 : vector<8x32xi1>, vector<8x32xf32>
    %cst_121 = arith.constant 9.99999997E-7 : f32
    %428 = vector.broadcast %cst_121 : f32 to vector<8x32xf32>
    %429 = arith.maximumf %427, %428 : vector<8x32xf32>
    %c0_122 = arith.constant 0 : index
    %430 = arith.index_cast %381 : i32 to index
    %c0_123 = arith.constant 0 : index
    %431 = vector.load %arg2[%c0_122, %430, %c0_123] : memref<1x64x32xf32, #tpu.memory_space<vmem>>, vector<1x8x32xf32>
    %432 = vector.shape_cast %431 : vector<1x8x32xf32> to vector<8x32xf32>
    %433 = arith.mulf %432, %429 : vector<8x32xf32>
    %434 = arith.addf %412, %433 : vector<8x32xf32>
    %435 = tpu.concatenate %434, %404, %412, %429 in 1 : vector<8x32xf32>, vector<8x32xf32>, vector<8x32xf32>, vector<8x32xf32> -> vector<8x128xf32>
    %c0_124 = arith.constant 0 : index
    %436 = arith.index_cast %381 : i32 to index
    %c0_125 = arith.constant 0 : index
    %437 = vector.load %arg7[%c0_124, %436, %c0_125] : memref<1x64x128xf32, #tpu.memory_space<vmem>>, vector<1x8x128xf32>
    %438 = vector.shape_cast %437 : vector<1x8x128xf32> to vector<8x128xf32>
    %439 = vector.shape_cast %435 : vector<8x128xf32> to vector<1x8x128xf32>
    tpu.vector_store %arg7[%c0_124, %436, %c0_125], %439 {strides = array<i32>} : memref<1x64x128xf32, #tpu.memory_space<vmem>>, vector<1x8x128xf32>,
    %c7_i32 = arith.constant 7 : i32
    %c8_i32_126 = arith.constant 8 : i32
    %440 = arith.muli %c7_i32, %c8_i32_126 : i32
    %441 = tpu.assume_multiple %440, 8 : i32
    %c0_127 = arith.constant 0 : index
    %442 = arith.index_cast %441 : i32 to index
    %c0_128 = arith.constant 0 : index
    %443 = vector.load %arg7[%c0_127, %442, %c0_128] : memref<1x64x128xf32, #tpu.memory_space<vmem>>, vector<1x8x128xf32>
    %444 = vector.shape_cast %443 : vector<1x8x128xf32> to vector<8x128xf32>
    %cst_129 = arith.constant dense<0.000000e+00> : vector<8x128xf32>
    %445 = tpu.matmul %434, %10, %cst_129 {dimension_numbers = #tpu.dot_dimension_numbers<[1], [0], [0], [1], [0, 0, 1, 1], [], []>} : vector<8x32xf32>, vector<32x128xf32>, vector<8x128xf32> -> vector<8x128xf32>
    %446 = arith.addf %444, %445 : vector<8x128xf32>
    %447 = arith.addf %446, %446 : vector<8x128xf32>
    %448 = arith.select %17, %447, %446 : vector<8x128xi1>, vector<8x128xf32>
    %449 = arith.negf %448 : vector<8x128xf32>
    %450 = math.exp %449 : vector<8x128xf32>
    %cst_130 = arith.constant 1.000000e+00 : f32
    %451 = vector.broadcast %cst_130 : f32 to vector<8x128xf32>
    %452 = arith.addf %451, %450 : vector<8x128xf32>
    %453 = arith.divf %451, %452 : vector<8x128xf32>
    %454 = arith.addf %453, %453 : vector<8x128xf32>
    %cst_131 = arith.constant 1.000000e+00 : f32
    %455 = vector.broadcast %cst_131 : f32 to vector<8x128xf32>
    %456 = arith.subf %454, %455 : vector<8x128xf32>
    %457 = arith.select %17, %456, %453 : vector<8x128xi1>, vector<8x128xf32>
    %458 = vector.extract_strided_slice %457 {offsets = [0, 0], sizes = [8, 32], strides = [1, 1]} : vector<8x128xf32> to vector<8x32xf32>
    %459 = vector.extract_strided_slice %457 {offsets = [0, 32], sizes = [8, 32], strides = [1, 1]} : vector<8x128xf32> to vector<8x32xf32>
    %460 = vector.extract_strided_slice %457 {offsets = [0, 64], sizes = [8, 32], strides = [1, 1]} : vector<8x128xf32> to vector<8x32xf32>
    %461 = vector.extract_strided_slice %457 {offsets = [0, 96], sizes = [8, 32], strides = [1, 1]} : vector<8x128xf32> to vector<8x32xf32>
    %462 = arith.mulf %459, %404 : vector<8x32xf32>
    %463 = arith.mulf %458, %460 : vector<8x32xf32>
    %464 = arith.addf %462, %463 : vector<8x32xf32>
    %465 = math.tanh %404 : vector<8x32xf32>
    %466 = arith.mulf %461, %465 : vector<8x32xf32>
    %cst_132 = arith.constant dense<0.000000e+00> : vector<8x64xf32>
    %467 = tpu.matmul %466, %11, %cst_132 {dimension_numbers = #tpu.dot_dimension_numbers<[1], [0], [0], [1], [0, 0, 1, 1], [], []>} : vector<8x32xf32>, vector<32x64xf32>, vector<8x64xf32> -> vector<8x64xf32>
    %468 = vector.extract_strided_slice %467 {offsets = [0, 0], sizes = [8, 32], strides = [1, 1]} : vector<8x64xf32> to vector<8x32xf32>
    %cst_133 = arith.constant 9.99999997E-7 : f32
    %cst_134 = arith.constant 1.000000e+06 : f32
    %469 = vector.broadcast %cst_133 : f32 to vector<8x32xf32>
    %470 = arith.maximumf %469, %468 : vector<8x32xf32>
    %471 = vector.broadcast %cst_134 : f32 to vector<8x32xf32>
    %472 = arith.minimumf %471, %470 : vector<8x32xf32>
    %473 = vector.extract_strided_slice %467 {offsets = [0, 32], sizes = [8, 32], strides = [1, 1]} : vector<8x64xf32> to vector<8x32xf32>
    %cst_135 = arith.constant 0.000000e+00 : f32
    %474 = vector.broadcast %cst_135 : f32 to vector<8x32xf32>
    %475 = arith.maximumf %473, %474 : vector<8x32xf32>
    %476 = vector.broadcast %cst_135 : f32 to vector<8x32xf32>
    %477 = arith.subf %473, %476 : vector<8x32xf32>
    %478 = arith.cmpf one, %477, %477 : vector<8x32xf32>
    %479 = vector.broadcast %cst_135 : f32 to vector<8x32xf32>
    %480 = arith.addf %473, %479 : vector<8x32xf32>
    %481 = math.absf %477 : vector<8x32xf32>
    %cst_136 = arith.constant 0.000000e+00 : f32
    %482 = vector.broadcast %cst_136 : f32 to vector<8x32xf32>
    %483 = arith.subf %482, %481 : vector<8x32xf32>
    %484 = math.exp %483 : vector<8x32xf32>
    %485 = math.log1p %484 : vector<8x32xf32>
    %486 = arith.addf %475, %485 : vector<8x32xf32>
    %487 = arith.select %478, %480, %486 : vector<8x32xi1>, vector<8x32xf32>
    %cst_137 = arith.constant 9.99999997E-7 : f32
    %488 = vector.broadcast %cst_137 : f32 to vector<8x32xf32>
    %489 = arith.maximumf %487, %488 : vector<8x32xf32>
    %c0_138 = arith.constant 0 : index
    %490 = arith.index_cast %441 : i32 to index
    %c0_139 = arith.constant 0 : index
    %491 = vector.load %arg2[%c0_138, %490, %c0_139] : memref<1x64x32xf32, #tpu.memory_space<vmem>>, vector<1x8x32xf32>
    %492 = vector.shape_cast %491 : vector<1x8x32xf32> to vector<8x32xf32>
    %493 = arith.mulf %492, %489 : vector<8x32xf32>
    %494 = arith.addf %472, %493 : vector<8x32xf32>
    %495 = tpu.concatenate %494, %464, %472, %489 in 1 : vector<8x32xf32>, vector<8x32xf32>, vector<8x32xf32>, vector<8x32xf32> -> vector<8x128xf32>
    %c0_140 = arith.constant 0 : index
    %496 = arith.index_cast %441 : i32 to index
    %c0_141 = arith.constant 0 : index
    %497 = vector.load %arg7[%c0_140, %496, %c0_141] : memref<1x64x128xf32, #tpu.memory_space<vmem>>, vector<1x8x128xf32>
    %498 = vector.shape_cast %497 : vector<1x8x128xf32> to vector<8x128xf32>
    %499 = vector.shape_cast %495 : vector<8x128xf32> to vector<1x8x128xf32>
    tpu.vector_store %arg7[%c0_140, %496, %c0_141], %499 {strides = array<i32>} : memref<1x64x128xf32, #tpu.memory_space<vmem>>, vector<1x8x128xf32>,
    %c8_i32_142 = arith.constant 8 : i32
    return
  }
  func.func @transform_0(%arg0: i32) -> (i32, i32, i32) {
    %c0_i32 = arith.constant 0 : i32
    %c0_i32_0 = arith.constant 0 : i32
    %c0_i32_1 = arith.constant 0 : i32
    return %arg0, %c0_i32, %c0_i32_0 : i32, i32, i32
  }
  func.func @transform_1(%arg0: i32) -> (i32, i32, i32) {
    %c0_i32 = arith.constant 0 : i32
    %c0_i32_0 = arith.constant 0 : i32
    %c0_i32_1 = arith.constant 0 : i32
    return %arg0, %c0_i32, %c0_i32_0 : i32, i32, i32
  }
  func.func @transform_2(%arg0: i32) -> (i32, i32) {
    %c0_i32 = arith.constant 0 : i32
    %c0_i32_0 = arith.constant 0 : i32
    %c0_i32_1 = arith.constant 0 : i32
    return %c0_i32, %c0_i32_0 : i32, i32
  }
  func.func @transform_3(%arg0: i32) -> (i32, i32) {
    %c0_i32 = arith.constant 0 : i32
    %c0_i32_0 = arith.constant 0 : i32
    %c0_i32_1 = arith.constant 0 : i32
    return %c0_i32, %c0_i32_0 : i32, i32
  }
  func.func @transform_4(%arg0: i32) -> (i32, i32) {
    %c0_i32 = arith.constant 0 : i32
    %c0_i32_0 = arith.constant 0 : i32
    %c0_i32_1 = arith.constant 0 : i32
    return %c0_i32, %c0_i32_0 : i32, i32
  }
  func.func @transform_5(%arg0: i32) -> (i32, i32) {
    %c0_i32 = arith.constant 0 : i32
    %c0_i32_0 = arith.constant 0 : i32
    %c0_i32_1 = arith.constant 0 : i32
    return %c0_i32, %c0_i32_0 : i32, i32
  }
  func.func @transform_6(%arg0: i32) -> (i32, i32, i32) {
    %c0_i32 = arith.constant 0 : i32
    %c0_i32_0 = arith.constant 0 : i32
    %c0_i32_1 = arith.constant 0 : i32
    return %arg0, %c0_i32, %c0_i32_0 : i32, i32, i32
  }
}

</mosaic_0001>

<bundles_post_ra>
// kernel: tpu_custom_call.1
= control target key start
LH: loop header
LB: loop body
LE: loop exit
PB: predicated region body
PF: predicated region fallthrough
CT: control target
= control target key end

     0   :  { %vm41_vm0 = vcmask 130048   ;;  %v2495_v4 = vmov 0.0|0.0   ;;  %vm2496_vm1 = vmmov 0   ;;  %v2497_v10 = vmov 0.0   ;;  %s3050_s0 = inlined_call_operand.vmem [shape: f32[1,64,16], index: 0, kind: input, shape index: {}]   ;;  %s3051_s1 = inlined_call_operand.vmem [shape: f32[1,64,32], index: 1, kind: input, shape index: {}]   ;;  %s3052_s2 = inlined_call_operand.vmem [shape: f32[16,128], index: 2, kind: input, shape index: {}]   ;;  %s3053_s3 = inlined_call_operand.vmem [shape: f32[32,128], index: 3, kind: input, shape index: {}]   ;;  %s3054_s4 = inlined_call_operand.vmem [shape: f32[1,128], index: 4, kind: input, shape index: {}]   ;;  %s3055_s5 = inlined_call_operand.vmem [shape: f32[32,64], index: 5, kind: input, shape index: {}]   ;;  %s3056_s6 = inlined_call_operand.hbm [shape: f32[1,64,128], index: 6, kind: output, shape index: {}]  }
   0x1   :  { %v32_v0 = vld [vmem:[%s3052_s2] sm:$0xff]  ;;  %v33_v1 = vld [vmem:[%s3052_s2 + $0x8] sm:$0xff]  ;;  %2288 = vmatprep.subr.bf16.mxu1 %v2495_v4  ;;  %v181_v8 = vld [vmem:[%s3053_s3 + $0x10] sm:$0xff]  ;;  %2116 = vmatprep.mubr.msk.f32.mxu1 %vm2496_vm1, %v2497_v10 }
   0x2   :  { %v24_v2 = vld [vmem:[%s3050_s0] sm:$0xff]  ;;  %v2284_v3 = vpack.c.bf16 %v33_v1, %v32_v0  ;;  %v180_v6 = vld [vmem:[%s3053_s3 + $0x8] sm:$0xff]  ;;  %v182_v9 = vld [vmem:[%s3053_s3 + $0x18] sm:$0xff] }
   0x3   :  { %2096 = vmatprep.mubr.msk.f32.mxu0 %vm41_vm0, %v24_v2  ;;  %v179_v5 = vld [vmem:[%s3053_s3] sm:$0xff] }
   0x4   :  { %v2556_v7 = vpack.c.bf16 %v180_v6, %v179_v5 }
   0x5   :  { %11 = vsyncpa [#allocation3], 0  ;;  %2285 = vmatprep.subr.bf16.mxu0 %v2284_v3  ;;  %v25_v11 = vld [vmem:[%s3050_s0 + $0x8] sm:$0xff]  ;;  %v2570_v12 = vpack.c.bf16 %v182_v9, %v181_v8  ;;  %v183_v13 = vld [vmem:[%s3055_s5] sm:$0xff]  ;;  %v187_v19 = vlaneseq  ;;  %vm193_vm5 = vcmask 261120   ;;  %s2501_s22 = smov [#allocation2]  }
   0x6   :  { %2287 = vmatpush3.bf16.msra.mxu0 %v2284_v3  ;;  %2290 = vmatpush3.bf16.msra.mxu1 %v2556_v7  ;;  %v184_v14 = vld [vmem:[%s3055_s5 + $0x8] sm:$0xff]  ;;  %v185_v15 = vld [vmem:[%s3055_s5 + $0x10] sm:$0xff]  ;;  %v186_v17 = vld [vmem:[%s3055_s5 + $0x18] sm:$0xff]  ;;  %s2499_s5 = smov 32  }
   0x7   :  { %2291 = vmatprep.subr.bf16.mxu1 %v2495_v4  ;;  %2300 = vmatprep.subr.bf16.mxu0 %v2495_v4  ;;  %v2593_v16 = vpack.c.bf16 %v184_v14, %v183_v13  ;;  %v2599_v18 = vpack.c.bf16 %v186_v17, %v185_v15  ;;  %v2607_v20 = vld [vmem:[%s3054_s4] ss:$0 sm:$0xff]  ;;  %v188_v21 = vand.u32 127, %v187_v19  ;;  %s2498_s4 = smov 64   ;;  %v26_v42 = vld [vmem:[%s3050_s0 + $0x10] sm:$0xff]  ;;  %v27_v43 = vld [vmem:[%s3050_s0 + $0x18] sm:$0xff] }
   0x8   :  { %v28_v44 = vld [vmem:[%s3050_s0 + $0x20] sm:$0xff]  ;;  %v29_v45 = vld [vmem:[%s3050_s0 + $0x28] sm:$0xff]  ;;  %v30_v46 = vld [vmem:[%s3050_s0 + $0x30] sm:$0xff] }
   0x9   :  { %2097 = vmatmul.mubr.msk.f32.vlgmr.msra.gmra.mrb[0].mxu0 %vm41_vm0, %v25_v11  ;;  %vm189_vm2 = vcmp.ge.s32.totalorder %v188_v21, 64  ;;  %vm190_vm3 = vcmp.lt.s32.totalorder %v188_v21, 96  ;;  %v31_v47 = vld [vmem:[%s3050_s0 + $0x38] sm:$0xff]  ;;  %s2500_s0 = smov 96   ;;  %v386_v17 = vld [vmem:[%s3051_s1] sm:$0xff] }
   0xa   :  { %2293 = vmatpush3.bf16.msra.mxu1 %v2570_v12  ;;  %2302 = vmatpush3.bf16.msra.mxu0 %v2556_v7  ;;  %vm2612_vm4 = vmand %vm189_vm2, %vm190_vm3 }
   0xb   :  { %2294 = vmatprep.subr.bf16.mxu1 %v2495_v4  ;;  %2303 = vmatprep.subr.bf16.mxu0 %v2495_v4 }
   0xc   :  { %2099 = vmatprep.mubr.msk.f32.mxu0 %vm41_vm0, %v26_v42 }
   0xd   :  { %2117 = vmatmul.mubr.f32.vlgmr.msra.gmra.mrb[0].mxu1 %v2497_v10  ;;  %2100 = vmatmul.mubr.msk.f32.gmra.mrb[2].mxu0 %vm41_vm0, %v27_v43 }
   0xe   :  { %2127 = vmatprep.mubr.msk.f32.mxu1 %vm2496_vm1, %v2497_v10  ;;  %2305 = vmatpush3.bf16.msra.mxu0 %v2570_v12 }
   0xf   :  { %2312 = vmatprep.subr.bf16.mxu0 %v2495_v4  ;;  %2296 = vmatpush3.bf16.msra.mxu1 %v2593_v16 }
  0x10   :  { %2297 = vmatprep.subr.bf16.mxu1 %v2495_v4  ;;  %2102 = vmatprep.mubr.msk.f32.mxu0 %vm41_vm0, %v28_v44 }
  0x11   :  { %2103 = vmatmul.mubr.msk.f32.gmra.mrb[4].mxu0 %vm41_vm0, %v29_v45 }
  0x12   :  { %2105 = vmatprep.mubr.msk.f32.mxu0 %vm41_vm0, %v30_v46 }
  0x13   :  { %2299 = vmatpush3.bf16.msra.mxu1 %v2599_v18 }
  0x14   :  { %2306 = vmatprep.subr.bf16.mxu1 %v2495_v4 }
  0x15   :  { %2106 = vmatmul.mubr.msk.f32.gmra.mrb[6].mxu0 %vm41_vm0, %v31_v47 }
  0x16   :  { %2138 = vmatprep.mubr.msk.f32.mxu0 %vm2496_vm1, %v2497_v10 }
  0xdc   :  { %v2609_v22 = vpop.f32.mrb[0].mxu0 }
  0xdd   :  { %v132_v23 = vpop.f32.mrb[1].mxu0 }
  0xde   :  { %v133_v24 = vadd.f32 %v2607_v20, %v132_v23 }
  0xe0   :  { %v263_v25 = vpop.f32.mrb[0].mxu1  ;;  %v2666_v6 = vpop.f32.mrb[2].mxu0 }
  0xe1   :  { %v267_v26 = vadd.f32 %v263_v25, %v133_v24  ;;  %v2118_v27 = vpop.f32.mrb[1].mxu1  ;;  %v2668_v8 = vpop.f32.mrb[3].mxu0  ;;  %v138_v25 = vadd.f32 %v2609_v22, %v2607_v20 }
  0xe3   :  { %v268_v29 = vadd.f32 %v267_v26, %v267_v26 }
  0xe4   :  { %v2670_v9 = vpop.f32.mrb[4].mxu0 }
  0xe5   :  { %v269_v30 = vsel %vm2612_vm4, %v268_v29, %v267_v26  ;;  %v2672_v11 = vpop.f32.mrb[5].mxu0 }
  0xe6   :  { %v1964_v31 = vmul.f32 -1.442695, %v269_v30 }
  0xe8   :  { %2393 = vpow2.f32 %v1964_v31  ;;  %v2674_v13 = vpop.f32.mrb[6].mxu0 }
  0xe9   :  { %v2676_v14 = vpop.f32.mrb[7].mxu0 }
  0xf2   :  { %v2394_v32 = vpop.eup %2393 }
  0xf3   :  { %v273_v33 = vadd.f32 1.0, %v2394_v32 }
  0xf5   :  { %2395 = vrcp.f32 %v273_v33 }
  0xff   :  { %v2396_v34 = vpop.eup %2395 }
 0x100   :  { %v276_v35 = vadd.f32 %v2396_v34, %v2396_v34 }
 0x102   :  { %v1965_v36 = vadd.f32 -1.0, %v276_v35 }
 0x104   :  { %v278_v37 = vsel %vm2612_vm4, %v1965_v36, %v2396_v34 }
 0x105   :  { %281 = vrot.lane.b32.xlu1 %v278_v37, %s2498_s4  ;;  %v279_v38 = vmul.f32 0.0, %v278_v37 }
 0x107   :  { %291 = vrot.lane.b32.xlu0 %v279_v38, %s2499_s5 }
 0x177   :  { %v282_v39 = vpop.permute.xlu1 %281 }
 0x178   :  { %v284_v40 = vmul.f32 %v282_v39, %v278_v37 }
 0x179   :  { %v292_v41 = vpop.permute.xlu0 %291 }
 0x17a   :  { %286 = vrot.lane.b32.xlu1 %v284_v40, %s2499_s5  ;;  %2128 = vmatmul.mubr.msk.f32.vlgmr.msra.gmra.mrb[2].mxu1 %vm193_vm5, %v292_v41 }
 0x17b   :  { %2308 = vmatpush3.bf16.msra.mxu1 %v2593_v16  ;;  %2149 = vmatprep.mubr.msk.f32.mxu1 %vm2496_vm1, %v2497_v10 }
 0x17c   :  { %2309 = vmatprep.subr.bf16.mxu1 %v2495_v4 }
 0x17f   :  { %2311 = vmatpush3.bf16.msra.mxu1 %v2599_v18 }
 0x180   :  { %2318 = vmatprep.subr.bf16.mxu1 %v2495_v4 }
 0x1ec   :  { %v287_v56 = vpop.permute.xlu1 %286 }
 0x1ed   :  { %v2656_v58 = vadd.f32 %v287_v56, %v279_v38 }
 0x24d   :  { %v361_v48 = vpop.f32.mrb[2].mxu1 }
 0x24e   :  { %v370_v49 = vand.u32 2147483647, %v361_v48  ;;  %v2129_v50 = vpop.f32.mrb[3].mxu1  ;;  %v367_v63 = vmax.f32 %v361_v48, 0.0  ;;  %vm368_vm7 = vcmp.ne.f32.partialorder %v361_v48, %v361_v48  ;;  %v365_v15 = vmax.f32 %v361_v48, 1e-06 }
 0x250   :  { %v371_v51 = vsub.f32 0.0, %v370_v49  ;;  %v2681_v21 = vmin.f32 %v365_v15, 1000000.0 }
 0x252   :  { %v372_v52 = vmul.f32 1.442695, %v371_v51 }
 0x254   :  { %2397 = vpow2.f32 %v372_v52 }
 0x25e   :  { %v2398_v53 = vpop.eup %2397 }
 0x25f   :  { %v374_v54 = vadd.f32 1.0, %v2398_v53  ;;  %v377_v55 = vmul.f32 -0.5, %v2398_v53  ;;  %v380_v59 = vand.u32 2147483647, %v2398_v53 }
 0x261   :  { %2399 = vlog2.f32 %v374_v54  ;;  %v378_v57 = vadd.f32 1.0, %v377_v55  ;;  %vm381_vm6 = vcmp.lt.f32.partialorder %v380_v59, 0.0004427343 }
 0x262   :  { %2401 = vtanh.f32 %v2656_v58 }
 0x263   :  { %v379_v62 = vmul.f32 %v2398_v53, %v378_v57 }
 0x26b   :  { %v2400_v60 = vpop.eup %2399 }
 0x26c   :  { %v376_v61 = vmul.f32 0.6931472, %v2400_v60  ;;  %v2402_v5 = vpop.eup %2401 }
 0x26e   :  { %v382_v0 = vsel %vm381_vm6, %v379_v62, %v376_v61  ;;  %vm403_vm6 = vcmask 785408  }
 0x26f   :  { %v383_v1 = vadd.f32 %v382_v0, %v367_v63  ;;  %v1971_v63 = vld [vmem:[%s3051_s1 + $0x8] sm:$0xff] }
 0x271   :  { %v2659_v2 = vsel %vm368_vm7, %v361_v48, %v383_v1 }
 0x272   :  { %v385_v3 = vmax.f32 %v2659_v2, 1e-06 }
 0x274   :  { %388 = vrot.lane.b32.xlu0 %v385_v3, %s2500_s0 }
 0x278   :  { %506 = vrot.lane.b32.xlu0 %v2402_v5, %s2498_s4 }
 0x2e6   :  { %v389_v19 = vpop.permute.xlu0 %388 }
 0x2e7   :  { %v391_v23 = vmul.f32 %v389_v19, %v386_v17 }
 0x2e9   :  { %v2684_v24 = vadd.f32 %v391_v23, %v2681_v21 }
 0x2ea   :  { %v507_v38 = vpop.permute.xlu0 %506 }
 0x2eb   :  { %2139 = vmatmul.mubr.msk.f32.vlgmr.msra.gmra.mrb[8].mxu0 %vm193_vm5, %v2684_v24 }
 0x2ec   :  { %2314 = vmatpush3.bf16.msra.mxu0 %v2556_v7  ;;  %2160 = vmatprep.mubr.msk.f32.mxu0 %vm2496_vm1, %v2497_v10 }
 0x2ed   :  { %2315 = vmatprep.subr.bf16.mxu0 %v2495_v4 }
 0x2f0   :  { %2317 = vmatpush3.bf16.msra.mxu0 %v2570_v12 }
 0x2f1   :  { %2324 = vmatprep.subr.bf16.mxu0 %v2495_v4 }
 0x3be   :  { %v477_v26 = vpop.f32.mrb[8].mxu0 }
 0x3bf   :  { %v481_v27 = vadd.f32 %v477_v26, %v138_v25  ;;  %v2140_v29 = vpop.f32.mrb[9].mxu0  ;;  %v143_v26 = vadd.f32 %v2607_v20, %v2668_v8 }
 0x3c1   :  { %v482_v30 = vadd.f32 %v481_v27, %v481_v27 }
 0x3c3   :  { %v483_v31 = vsel %vm2612_vm4, %v482_v30, %v481_v27 }
 0x3c4   :  { %v1968_v32 = vmul.f32 -1.442695, %v483_v31 }
 0x3c6   :  { %2403 = vpow2.f32 %v1968_v32 }
 0x3d0   :  { %v2404_v33 = vpop.eup %2403 }
 0x3d1   :  { %v487_v34 = vadd.f32 1.0, %v2404_v33 }
 0x3d3   :  { %2405 = vrcp.f32 %v487_v34 }
 0x3dd   :  { %v2406_v35 = vpop.eup %2405 }
 0x3de   :  { %v490_v36 = vadd.f32 %v2406_v35, %v2406_v35 }
 0x3e0   :  { %v1969_v37 = vadd.f32 -1.0, %v490_v36 }
 0x3e2   :  { %v492_v39 = vsel %vm2612_vm4, %v1969_v37, %v2406_v35 }
 0x3e3   :  { %v509_v22 = vmul.f32 %v507_v38, %v492_v39  ;;  %v493_v17 = vmul.f32 %v492_v39, %v2656_v58 }
 0x3e5   :  { %511 = vrot.lane.b32.xlu1 %v509_v22, %s2499_s5 }
 0x3e9   :  { %495 = vrot.lane.b32.xlu1 %v492_v39, %s2498_s4 }
 0x457   :  { %v512_v40 = vpop.permute.xlu1 %511 }
 0x458   :  { %2150 = vmatmul.mubr.msk.f32.vlgmr.msra.gmra.mrb[4].mxu1 %vm193_vm5, %v512_v40 }
 0x459   :  { %2320 = vmatpush3.bf16.msra.mxu1 %v2593_v16  ;;  %2171 = vmatprep.mubr.msk.f32.mxu1 %vm2496_vm1, %v2497_v10 }
 0x45a   :  { %2321 = vmatprep.subr.bf16.mxu1 %v2495_v4 }
 0x45b   :  { %v496_v60 = vpop.permute.xlu1 %495 }
 0x45c   :  { %v498_v61 = vmul.f32 %v496_v60, %v492_v39 }
 0x45d   :  { %2323 = vmatpush3.bf16.msra.mxu1 %v2599_v18 }
 0x45e   :  { %2330 = vmatprep.subr.bf16.mxu1 %v2495_v4 }
 0x52b   :  { %v581_v41 = vpop.f32.mrb[4].mxu1 }
 0x52c   :  { %v590_v42 = vand.u32 2147483647, %v581_v41  ;;  %v2151_v43 = vpop.f32.mrb[5].mxu1  ;;  %v587_v54 = vmax.f32 %v581_v41, 0.0  ;;  %vm588_vm9 = vcmp.ne.f32.partialorder %v581_v41, %v581_v41  ;;  %v585_v62 = vmax.f32 %v581_v41, 1e-06 }
 0x52e   :  { %v591_v44 = vsub.f32 0.0, %v590_v42  ;;  %v2719_v1 = vmin.f32 %v585_v62, 1000000.0 }
 0x530   :  { %v592_v45 = vmul.f32 1.442695, %v591_v44 }
 0x532   :  { %2407 = vpow2.f32 %v592_v45 }
 0x53c   :  { %v2408_v46 = vpop.eup %2407 }
 0x53d   :  { %v594_v47 = vadd.f32 1.0, %v2408_v46  ;;  %v597_v48 = vmul.f32 -0.5, %v2408_v46  ;;  %v600_v50 = vand.u32 2147483647, %v2408_v46 }
 0x53f   :  { %2409 = vlog2.f32 %v594_v47  ;;  %v598_v49 = vadd.f32 1.0, %v597_v48  ;;  %vm601_vm8 = vcmp.lt.f32.partialorder %v600_v50, 0.0004427343 }
 0x541   :  { %v599_v53 = vmul.f32 %v2408_v46, %v598_v49 }
 0x549   :  { %v2410_v51 = vpop.eup %2409 }
 0x54a   :  { %v596_v52 = vmul.f32 0.6931472, %v2410_v51 }
 0x54c   :  { %v602_v55 = vsel %vm601_vm8, %v599_v53, %v596_v52 }
 0x54d   :  { %v603_v56 = vadd.f32 %v602_v55, %v587_v54 }
 0x54f   :  { %v2709_v57 = vsel %vm588_vm9, %v581_v41, %v603_v56 }
 0x550   :  { %v605_v59 = vmax.f32 %v2709_v57, 1e-06 }
 0x552   :  { %609 = vrot.lane.b32.xlu0 %v605_v59, %s2500_s0 }
 0x556   :  { %500 = vrot.lane.b32.xlu0 %v498_v61, %s2499_s5 }
 0x5c4   :  { %v610_v0 = vpop.permute.xlu0 %609 }
 0x5c5   :  { %v612_v5 = vmul.f32 %v1971_v63, %v610_v0 }
 0x5c7   :  { %v2722_v15 = vadd.f32 %v612_v5, %v2719_v1  ;;  %v1976_v5 = vld [vmem:[%s3051_s1 + $0x10] sm:$0xff] }
 0x5c8   :  { %v501_v19 = vpop.permute.xlu0 %500 }
 0x5c9   :  { %v2725_v23 = vadd.f32 %v501_v19, %v493_v17  ;;  %2161 = vmatmul.mubr.msk.f32.vlgmr.msra.gmra.mrb[10].mxu0 %vm193_vm5, %v2722_v15 }
 0x5ca   :  { %2326 = vmatpush3.bf16.msra.mxu0 %v2556_v7  ;;  %2182 = vmatprep.mubr.msk.f32.mxu0 %vm2496_vm1, %v2497_v10 }
 0x5cb   :  { %2411 = vtanh.f32 %v2725_v23  ;;  %2327 = vmatprep.subr.bf16.mxu0 %v2495_v4 }
 0x5ce   :  { %2329 = vmatpush3.bf16.msra.mxu0 %v2570_v12 }
 0x5cf   :  { %2336 = vmatprep.subr.bf16.mxu0 %v2495_v4 }
 0x5d5   :  { %v2412_v25 = vpop.eup %2411 }
 0x5d6   :  { %725 = vrot.lane.b32.xlu1 %v2412_v25, %s2498_s4 }
 0x648   :  { %v726_v39 = vpop.permute.xlu1 %725 }
 0x69c   :  { %v696_v27 = vpop.f32.mrb[10].mxu0 }
 0x69d   :  { %v700_v29 = vadd.f32 %v696_v27, %v143_v26  ;;  %v2162_v30 = vpop.f32.mrb[11].mxu0 }
 0x69f   :  { %v701_v31 = vadd.f32 %v700_v29, %v700_v29 }
 0x6a1   :  { %v702_v32 = vsel %vm2612_vm4, %v701_v31, %v700_v29 }
 0x6a2   :  { %v1973_v33 = vmul.f32 -1.442695, %v702_v32  ;;  %v148_v32 = vadd.f32 %v2666_v6, %v2607_v20 }
 0x6a4   :  { %2413 = vpow2.f32 %v1973_v33 }
 0x6ae   :  { %v2414_v34 = vpop.eup %2413 }
 0x6af   :  { %v706_v35 = vadd.f32 1.0, %v2414_v34 }
 0x6b1   :  { %2415 = vrcp.f32 %v706_v35 }
 0x6bb   :  { %v2416_v36 = vpop.eup %2415 }
 0x6bc   :  { %v709_v37 = vadd.f32 %v2416_v36, %v2416_v36 }
 0x6be   :  { %v1974_v38 = vadd.f32 -1.0, %v709_v37 }
 0x6c0   :  { %v711_v22 = vsel %vm2612_vm4, %v1974_v38, %v2416_v36 }
 0x6c1   :  { %v728_v8 = vmul.f32 %v726_v39, %v711_v22  ;;  %v712_v27 = vmul.f32 %v711_v22, %v2725_v23 }
 0x6c3   :  { %730 = vrot.lane.b32.xlu0 %v728_v8, %s2499_s5 }
 0x6c7   :  { %714 = vrot.lane.b32.xlu0 %v711_v22, %s2498_s4 }
 0x735   :  { %v731_v40 = vpop.permute.xlu0 %730 }
 0x736   :  { %2172 = vmatmul.mubr.msk.f32.vlgmr.msra.gmra.mrb[6].mxu1 %vm193_vm5, %v731_v40 }
 0x737   :  { %2332 = vmatpush3.bf16.msra.mxu1 %v2593_v16  ;;  %2193 = vmatprep.mubr.msk.f32.mxu1 %vm2496_vm1, %v2497_v10 }
 0x738   :  { %2333 = vmatprep.subr.bf16.mxu1 %v2495_v4 }
 0x739   :  { %v715_v62 = vpop.permute.xlu0 %714 }
 0x73a   :  { %v717_v63 = vmul.f32 %v715_v62, %v711_v22 }
 0x73b   :  { %2335 = vmatpush3.bf16.msra.mxu1 %v2599_v18 }
 0x73c   :  { %2342 = vmatprep.subr.bf16.mxu1 %v2495_v4 }
 0x809   :  { %v800_v41 = vpop.f32.mrb[6].mxu1 }
 0x80a   :  { %v809_v42 = vand.u32 2147483647, %v800_v41  ;;  %v2173_v43 = vpop.f32.mrb[7].mxu1  ;;  %v806_v54 = vmax.f32 %v800_v41, 0.0  ;;  %vm807_vm11 = vcmp.ne.f32.partialorder %v800_v41, %v800_v41  ;;  %v804_v0 = vmax.f32 %v800_v41, 1e-06 }
 0x80c   :  { %v810_v44 = vsub.f32 0.0, %v809_v42  ;;  %v2762_v19 = vmin.f32 %v804_v0, 1000000.0 }
 0x80e   :  { %v811_v45 = vmul.f32 1.442695, %v810_v44 }
 0x810   :  { %2417 = vpow2.f32 %v811_v45 }
 0x81a   :  { %v2418_v46 = vpop.eup %2417 }
 0x81b   :  { %v813_v47 = vadd.f32 1.0, %v2418_v46  ;;  %v816_v48 = vmul.f32 -0.5, %v2418_v46  ;;  %v819_v50 = vand.u32 2147483647, %v2418_v46 }
 0x81d   :  { %2419 = vlog2.f32 %v813_v47  ;;  %v817_v49 = vadd.f32 1.0, %v816_v48  ;;  %vm820_vm10 = vcmp.lt.f32.partialorder %v819_v50, 0.0004427343 }
 0x81f   :  { %v818_v53 = vmul.f32 %v2418_v46, %v817_v49 }
 0x827   :  { %v2420_v51 = vpop.eup %2419 }
 0x828   :  { %v815_v52 = vmul.f32 0.6931472, %v2420_v51 }
 0x82a   :  { %v821_v55 = vsel %vm820_vm10, %v818_v53, %v815_v52 }
 0x82b   :  { %v822_v56 = vadd.f32 %v821_v55, %v806_v54 }
 0x82d   :  { %v2752_v60 = vsel %vm807_vm11, %v800_v41, %v822_v56 }
 0x82e   :  { %v824_v61 = vmax.f32 %v2752_v60, 1e-06 }
 0x830   :  { %828 = vrot.lane.b32.xlu1 %v824_v61, %s2500_s0 }
 0x834   :  { %719 = vrot.lane.b32.xlu1 %v717_v63, %s2499_s5 }
 0x8a2   :  { %v829_v17 = vpop.permute.xlu1 %828 }
 0x8a3   :  { %v831_v25 = vmul.f32 %v1976_v5, %v829_v17 }
 0x8a5   :  { %v2765_v26 = vadd.f32 %v831_v25, %v2762_v19 }
 0x8a6   :  { %v720_v29 = vpop.permute.xlu1 %719 }
 0x8a7   :  { %v2768_v30 = vadd.f32 %v720_v29, %v712_v27  ;;  %2183 = vmatmul.mubr.msk.f32.vlgmr.msra.gmra.mrb[12].mxu0 %vm193_vm5, %v2765_v26 }
 0x8a8   :  { %2338 = vmatpush3.bf16.msra.mxu0 %v2556_v7  ;;  %2204 = vmatprep.mubr.msk.f32.mxu0 %vm2496_vm1, %v2497_v10 }
 0x8a9   :  { %2421 = vtanh.f32 %v2768_v30  ;;  %2339 = vmatprep.subr.bf16.mxu0 %v2495_v4 }
 0x8ac   :  { %2341 = vmatpush3.bf16.msra.mxu0 %v2570_v12 }
 0x8ad   :  { %2348 = vmatprep.subr.bf16.mxu0 %v2495_v4 }
 0x8b3   :  { %v2422_v31 = vpop.eup %2421 }
 0x8b4   :  { %944 = vrot.lane.b32.xlu0 %v2422_v31, %s2498_s4 }
 0x926   :  { %v945_v42 = vpop.permute.xlu0 %944 }
 0x97a   :  { %v915_v33 = vpop.f32.mrb[12].mxu0 }
 0x97b   :  { %v919_v34 = vadd.f32 %v915_v33, %v148_v32  ;;  %v2184_v35 = vpop.f32.mrb[13].mxu0  ;;  %v1981_v32 = vld [vmem:[%s3051_s1 + $0x18] sm:$0xff] }
 0x97d   :  { %v920_v36 = vadd.f32 %v919_v34, %v919_v34 }
 0x97f   :  { %v921_v37 = vsel %vm2612_vm4, %v920_v36, %v919_v34 }
 0x980   :  { %v1978_v38 = vmul.f32 -1.442695, %v921_v37 }
 0x982   :  { %2423 = vpow2.f32 %v1978_v38 }
 0x98c   :  { %v2424_v39 = vpop.eup %2423 }
 0x98d   :  { %v925_v22 = vadd.f32 1.0, %v2424_v39 }
 0x98f   :  { %2425 = vrcp.f32 %v925_v22 }
 0x999   :  { %v2426_v8 = vpop.eup %2425 }
 0x99a   :  { %v928_v40 = vadd.f32 %v2426_v8, %v2426_v8 }
 0x99c   :  { %v1979_v41 = vadd.f32 -1.0, %v928_v40 }
 0x99e   :  { %v930_v43 = vsel %vm2612_vm4, %v1979_v41, %v2426_v8  ;;  %v153_v8 = vadd.f32 %v2607_v20, %v2672_v11 }
 0x99f   :  { %v947_v6 = vmul.f32 %v945_v42, %v930_v43  ;;  %v931_v37 = vmul.f32 %v930_v43, %v2768_v30 }
 0x9a1   :  { %949 = vrot.lane.b32.xlu1 %v947_v6, %s2499_s5 }
 0x9a5   :  { %933 = vrot.lane.b32.xlu1 %v930_v43, %s2498_s4 }
 0xa13   :  { %v950_v44 = vpop.permute.xlu1 %949 }
 0xa14   :  { %2194 = vmatmul.mubr.msk.f32.vlgmr.msra.gmra.mrb[8].mxu1 %vm193_vm5, %v950_v44 }
 0xa15   :  { %2344 = vmatpush3.bf16.msra.mxu1 %v2593_v16  ;;  %2215 = vmatprep.mubr.msk.f32.mxu1 %vm2496_vm1, %v2497_v10 }
 0xa16   :  { %2345 = vmatprep.subr.bf16.mxu1 %v2495_v4 }
 0xa17   :  { %v934_v27 = vpop.permute.xlu1 %933 }
 0xa18   :  { %v936_v29 = vmul.f32 %v934_v27, %v930_v43 }
 0xa19   :  { %2347 = vmatpush3.bf16.msra.mxu1 %v2599_v18 }
 0xa1a   :  { %2354 = vmatprep.subr.bf16.mxu1 %v2495_v4 }
 0xae7   :  { %v1019_v45 = vpop.f32.mrb[8].mxu1 }
 0xae8   :  { %v1028_v46 = vand.u32 2147483647, %v1019_v45  ;;  %v2195_v47 = vpop.f32.mrb[9].mxu1  ;;  %v1025_v63 = vmax.f32 %v1019_v45, 0.0  ;;  %vm1026_vm13 = vcmp.ne.f32.partialorder %v1019_v45, %v1019_v45  ;;  %v1023_v31 = vmax.f32 %v1019_v45, 1e-06 }
 0xaea   :  { %v1029_v48 = vsub.f32 0.0, %v1028_v46  ;;  %v2805_v34 = vmin.f32 %v1023_v31, 1000000.0 }
 0xaec   :  { %v1030_v49 = vmul.f32 1.442695, %v1029_v48 }
 0xaee   :  { %2427 = vpow2.f32 %v1030_v49 }
 0xaf8   :  { %v2428_v50 = vpop.eup %2427 }
 0xaf9   :  { %v1032_v51 = vadd.f32 1.0, %v2428_v50  ;;  %v1035_v52 = vmul.f32 -0.5, %v2428_v50  ;;  %v1038_v54 = vand.u32 2147483647, %v2428_v50 }
 0xafb   :  { %2429 = vlog2.f32 %v1032_v51  ;;  %v1036_v53 = vadd.f32 1.0, %v1035_v52  ;;  %vm1039_vm12 = vcmp.lt.f32.partialorder %v1038_v54, 0.0004427343 }
 0xafd   :  { %v1037_v62 = vmul.f32 %v2428_v50, %v1036_v53 }
 0xb05   :  { %v2430_v55 = vpop.eup %2429 }
 0xb06   :  { %v1034_v56 = vmul.f32 0.6931472, %v2430_v55 }
 0xb08   :  { %v1040_v0 = vsel %vm1039_vm12, %v1037_v62, %v1034_v56 }
 0xb09   :  { %v1041_v5 = vadd.f32 %v1040_v0, %v1025_v63 }
 0xb0b   :  { %v2795_v17 = vsel %vm1026_vm13, %v1019_v45, %v1041_v5 }
 0xb0c   :  { %v1043_v25 = vmax.f32 %v2795_v17, 1e-06 }
 0xb0e   :  { %1047 = vrot.lane.b32.xlu0 %v1043_v25, %s2500_s0 }
 0xb12   :  { %938 = vrot.lane.b32.xlu0 %v936_v29, %s2499_s5 }
 0xb80   :  { %v1048_v33 = vpop.permute.xlu0 %1047 }
 0xb81   :  { %v1050_v35 = vmul.f32 %v1981_v32, %v1048_v33 }
 0xb83   :  { %v2808_v36 = vadd.f32 %v1050_v35, %v2805_v34 }
 0xb84   :  { %v939_v38 = vpop.permute.xlu0 %938 }
 0xb85   :  { %v2811_v39 = vadd.f32 %v939_v38, %v931_v37  ;;  %2205 = vmatmul.mubr.msk.f32.vlgmr.msra.gmra.mrb[14].mxu0 %vm193_vm5, %v2808_v36 }
 0xb86   :  { %2350 = vmatpush3.bf16.msra.mxu0 %v2556_v7  ;;  %2226 = vmatprep.mubr.msk.f32.mxu0 %vm2496_vm1, %v2497_v10 }
 0xb87   :  { %2431 = vtanh.f32 %v2811_v39  ;;  %2351 = vmatprep.subr.bf16.mxu0 %v2495_v4 }
 0xb8a   :  { %2353 = vmatpush3.bf16.msra.mxu0 %v2570_v12 }
 0xb8b   :  { %2360 = vmatprep.subr.bf16.mxu0 %v2495_v4 }
 0xb91   :  { %v2432_v22 = vpop.eup %2431 }
 0xb92   :  { %1163 = vrot.lane.b32.xlu1 %v2432_v22, %s2498_s4 }
 0xc04   :  { %v1164_v50 = vpop.permute.xlu1 %1163 }
 0xc58   :  { %v1134_v40 = vpop.f32.mrb[14].mxu0 }
 0xc59   :  { %v1138_v41 = vadd.f32 %v1134_v40, %v153_v8  ;;  %v2206_v42 = vpop.f32.mrb[15].mxu0 }
 0xc5b   :  { %v1139_v43 = vadd.f32 %v1138_v41, %v1138_v41 }
 0xc5d   :  { %v1140_v6 = vsel %vm2612_vm4, %v1139_v43, %v1138_v41  ;;  %v1986_v43 = vld [vmem:[%s3051_s1 + $0x20] sm:$0xff] }
 0xc5e   :  { %v1983_v44 = vmul.f32 -1.442695, %v1140_v6 }
 0xc60   :  { %2433 = vpow2.f32 %v1983_v44 }
 0xc6a   :  { %v2434_v45 = vpop.eup %2433 }
 0xc6b   :  { %v1144_v46 = vadd.f32 1.0, %v2434_v45 }
 0xc6d   :  { %2435 = vrcp.f32 %v1144_v46 }
 0xc77   :  { %v2436_v47 = vpop.eup %2435 }
 0xc78   :  { %v1147_v48 = vadd.f32 %v2436_v47, %v2436_v47 }
 0xc7a   :  { %v1984_v49 = vadd.f32 -1.0, %v1147_v48 }
 0xc7c   :  { %v1149_v51 = vsel %vm2612_vm4, %v1984_v49, %v2436_v47 }
 0xc7d   :  { %v1166_v11 = vmul.f32 %v1164_v50, %v1149_v51  ;;  %v1150_v47 = vmul.f32 %v1149_v51, %v2811_v39 }
 0xc7f   :  { %1168 = vrot.lane.b32.xlu0 %v1166_v11, %s2499_s5 }
 0xc83   :  { %1152 = vrot.lane.b32.xlu0 %v1149_v51, %s2498_s4 }
 0xcf1   :  { %v1169_v52 = vpop.permute.xlu0 %1168 }
 0xcf2   :  { %2216 = vmatmul.mubr.msk.f32.vlgmr.msra.gmra.mrb[10].mxu1 %vm193_vm5, %v1169_v52 }
 0xcf3   :  { %2356 = vmatpush3.bf16.msra.mxu1 %v2593_v16  ;;  %2237 = vmatprep.mubr.msk.f32.mxu1 %vm2496_vm1, %v2497_v10 }
 0xcf4   :  { %2357 = vmatprep.subr.bf16.mxu1 %v2495_v4 }
 0xcf5   :  { %v1153_v40 = vpop.permute.xlu0 %1152 }
 0xcf6   :  { %v1155_v41 = vmul.f32 %v1153_v40, %v1149_v51  ;;  %v158_v51 = vadd.f32 %v2670_v9, %v2607_v20 }
 0xcf7   :  { %2359 = vmatpush3.bf16.msra.mxu1 %v2599_v18 }
 0xcf8   :  { %2366 = vmatprep.subr.bf16.mxu1 %v2495_v4 }
 0xdc5   :  { %v1238_v53 = vpop.f32.mrb[10].mxu1 }
 0xdc6   :  { %v1247_v54 = vand.u32 2147483647, %v1238_v53  ;;  %v2217_v55 = vpop.f32.mrb[11].mxu1  ;;  %v1244_v35 = vmax.f32 %v1238_v53, 0.0  ;;  %vm1245_vm15 = vcmp.ne.f32.partialorder %v1238_v53, %v1238_v53  ;;  %v1242_v42 = vmax.f32 %v1238_v53, 1e-06 }
 0xdc8   :  { %v1248_v56 = vsub.f32 0.0, %v1247_v54  ;;  %v2848_v44 = vmin.f32 %v1242_v42, 1000000.0 }
 0xdca   :  { %v1249_v62 = vmul.f32 1.442695, %v1248_v56 }
 0xdcc   :  { %2437 = vpow2.f32 %v1249_v62 }
 0xdd6   :  { %v2438_v63 = vpop.eup %2437 }
 0xdd7   :  { %v1251_v0 = vadd.f32 1.0, %v2438_v63  ;;  %v1254_v5 = vmul.f32 -0.5, %v2438_v63  ;;  %v1257_v29 = vand.u32 2147483647, %v2438_v63 }
 0xdd9   :  { %2439 = vlog2.f32 %v1251_v0  ;;  %v1255_v27 = vadd.f32 1.0, %v1254_v5  ;;  %vm1258_vm14 = vcmp.lt.f32.partialorder %v1257_v29, 0.0004427343 }
 0xddb   :  { %v1256_v33 = vmul.f32 %v2438_v63, %v1255_v27 }
 0xde3   :  { %v2440_v31 = vpop.eup %2439 }
 0xde4   :  { %v1253_v32 = vmul.f32 0.6931472, %v2440_v31 }
 0xde6   :  { %v1259_v37 = vsel %vm1258_vm14, %v1256_v33, %v1253_v32 }
 0xde7   :  { %v1260_v38 = vadd.f32 %v1259_v37, %v1244_v35 }
 0xde9   :  { %v2838_v22 = vsel %vm1245_vm15, %v1238_v53, %v1260_v38 }
 0xdea   :  { %v1262_v8 = vmax.f32 %v2838_v22, 1e-06 }
 0xdec   :  { %1266 = vrot.lane.b32.xlu1 %v1262_v8, %s2500_s0 }
 0xdf0   :  { %1157 = vrot.lane.b32.xlu1 %v1155_v41, %s2499_s5 }
 0xe5e   :  { %v1267_v6 = vpop.permute.xlu1 %1266 }
 0xe5f   :  { %v1269_v45 = vmul.f32 %v1986_v43, %v1267_v6 }
 0xe61   :  { %v2851_v46 = vadd.f32 %v1269_v45, %v2848_v44 }
 0xe62   :  { %v1158_v48 = vpop.permute.xlu1 %1157 }
 0xe63   :  { %v2854_v49 = vadd.f32 %v1158_v48, %v1150_v47  ;;  %2227 = vmatmul.mubr.msk.f32.vlgmr.msra.gmra.mrb[16].mxu0 %vm193_vm5, %v2851_v46 }
 0xe64   :  { %2362 = vmatpush3.bf16.msra.mxu0 %v2556_v7  ;;  %2248 = vmatprep.mubr.msk.f32.mxu0 %vm2496_vm1, %v2497_v10 }
 0xe65   :  { %2441 = vtanh.f32 %v2854_v49  ;;  %2363 = vmatprep.subr.bf16.mxu0 %v2495_v4 }
 0xe68   :  { %2365 = vmatpush3.bf16.msra.mxu0 %v2570_v12 }
 0xe69   :  { %2372 = vmatprep.subr.bf16.mxu0 %v2495_v4 }
 0xe6f   :  { %v2442_v50 = vpop.eup %2441 }
 0xe70   :  { %1382 = vrot.lane.b32.xlu0 %v2442_v50, %s2498_s4 }
 0xee2   :  { %v1383_v29 = vpop.permute.xlu0 %1382 }
 0xf36   :  { %v1353_v11 = vpop.f32.mrb[16].mxu0 }
 0xf37   :  { %v1357_v52 = vadd.f32 %v1353_v11, %v158_v51  ;;  %v2228_v53 = vpop.f32.mrb[17].mxu0 }
 0xf39   :  { %v1358_v54 = vadd.f32 %v1357_v52, %v1357_v52 }
 0xf3b   :  { %v1359_v55 = vsel %vm2612_vm4, %v1358_v54, %v1357_v52 }
 0xf3c   :  { %v1988_v56 = vmul.f32 -1.442695, %v1359_v55 }
 0xf3e   :  { %2443 = vpow2.f32 %v1988_v56 }
 0xf48   :  { %v2444_v62 = vpop.eup %2443 }
 0xf49   :  { %v1363_v63 = vadd.f32 1.0, %v2444_v62 }
 0xf4b   :  { %2445 = vrcp.f32 %v1363_v63  ;;  %v1991_v63 = vld [vmem:[%s3051_s1 + $0x28] sm:$0xff] }
 0xf55   :  { %v2446_v0 = vpop.eup %2445 }
 0xf56   :  { %v1366_v5 = vadd.f32 %v2446_v0, %v2446_v0 }
 0xf58   :  { %v1989_v27 = vadd.f32 -1.0, %v1366_v5 }
 0xf5a   :  { %v1368_v31 = vsel %vm2612_vm4, %v1989_v27, %v2446_v0 }
 0xf5b   :  { %v1385_v9 = vmul.f32 %v1383_v29, %v1368_v31 }
 0xf5d   :  { %1387 = vrot.lane.b32.xlu1 %v1385_v9, %s2499_s5  ;;  %v1369_v9 = vmul.f32 %v1368_v31, %v2854_v49 }
 0xf61   :  { %1371 = vrot.lane.b32.xlu1 %v1368_v31, %s2498_s4 }
 0xfcf   :  { %v1388_v32 = vpop.permute.xlu1 %1387 }
 0xfd0   :  { %2238 = vmatmul.mubr.msk.f32.vlgmr.msra.gmra.mrb[12].mxu1 %vm193_vm5, %v1388_v32 }
 0xfd1   :  { %2368 = vmatpush3.bf16.msra.mxu1 %v2593_v16  ;;  %2259 = vmatprep.mubr.msk.f32.mxu1 %vm2496_vm1, %v2497_v10 }
 0xfd2   :  { %2369 = vmatprep.subr.bf16.mxu1 %v2495_v4 }
 0xfd3   :  { %v1372_v55 = vpop.permute.xlu1 %1371 }
 0xfd4   :  { %v1374_v56 = vmul.f32 %v1372_v55, %v1368_v31  ;;  %v163_v31 = vadd.f32 %v2607_v20, %v2676_v14 }
 0xfd5   :  { %2371 = vmatpush3.bf16.msra.mxu1 %v2599_v18 }
 0xfd6   :  { %2378 = vmatprep.subr.bf16.mxu1 %v2495_v4 }
0x10a3   :  { %v1457_v33 = vpop.f32.mrb[12].mxu1 }
0x10a4   :  { %v1466_v35 = vand.u32 2147483647, %v1457_v33  ;;  %v2239_v37 = vpop.f32.mrb[13].mxu1  ;;  %v1463_v51 = vmax.f32 %v1457_v33, 0.0  ;;  %vm1464_vm2 = vcmp.ne.f32.partialorder %v1457_v33, %v1457_v33  ;;  %v1461_v62 = vmax.f32 %v1457_v33, 1e-06 }
0x10a6   :  { %v1467_v38 = vsub.f32 0.0, %v1466_v35  ;;  %v2891_v5 = vmin.f32 %v1461_v62, 1000000.0 }
0x10a8   :  { %v1468_v40 = vmul.f32 1.442695, %v1467_v38 }
0x10aa   :  { %2447 = vpow2.f32 %v1468_v40 }
0x10b4   :  { %v2448_v41 = vpop.eup %2447 }
0x10b5   :  { %v1470_v42 = vadd.f32 1.0, %v2448_v41  ;;  %v1473_v43 = vmul.f32 -0.5, %v2448_v41  ;;  %v1476_v45 = vand.u32 2147483647, %v2448_v41 }
0x10b7   :  { %2449 = vlog2.f32 %v1470_v42  ;;  %v1474_v6 = vadd.f32 1.0, %v1473_v43  ;;  %vm1477_vm0 = vcmp.lt.f32.partialorder %v1476_v45, 0.0004427343 }
0x10b9   :  { %v1475_v50 = vmul.f32 %v2448_v41, %v1474_v6 }
0x10c1   :  { %v2450_v47 = vpop.eup %2449 }
0x10c2   :  { %v1472_v48 = vmul.f32 0.6931472, %v2450_v47 }
0x10c4   :  { %v1478_v11 = vsel %vm1477_vm0, %v1475_v50, %v1472_v48 }
0x10c5   :  { %v1479_v52 = vadd.f32 %v1478_v11, %v1463_v51 }
0x10c7   :  { %v2881_v53 = vsel %vm1464_vm2, %v1457_v33, %v1479_v52 }
0x10c8   :  { %v1481_v54 = vmax.f32 %v2881_v53, 1e-06 }
0x10ca   :  { %1485 = vrot.lane.b32.xlu0 %v1481_v54, %s2500_s0 }
0x10ce   :  { %1376 = vrot.lane.b32.xlu0 %v1374_v56, %s2499_s5 }
0x113c   :  { %v1486_v0 = vpop.permute.xlu0 %1485 }
0x113d   :  { %v1488_v27 = vmul.f32 %v1991_v63, %v1486_v0 }
0x113f   :  { %v2894_v29 = vadd.f32 %v1488_v27, %v2891_v5 }
0x1140   :  { %v1377_v32 = vpop.permute.xlu0 %1376 }
0x1141   :  { %v2897_v35 = vadd.f32 %v1377_v32, %v1369_v9  ;;  %2249 = vmatmul.mubr.msk.f32.vlgmr.msra.gmra.mrb[18].mxu0 %vm193_vm5, %v2894_v29 }
0x1142   :  { %2374 = vmatpush3.bf16.msra.mxu0 %v2556_v7  ;;  %2270 = vmatprep.mubr.msk.f32.mxu0 %vm2496_vm1, %v2497_v10 }
0x1143   :  { %2451 = vtanh.f32 %v2897_v35  ;;  %2375 = vmatprep.subr.bf16.mxu0 %v2495_v4  ;;  %v1497_v2 = vsel %vm193_vm5, %v2894_v29, %v2897_v35 }
0x1146   :  { %2377 = vmatpush3.bf16.msra.mxu0 %v2570_v12 }
0x114d   :  { %v2452_v33 = vpop.eup %2451 }
0x114e   :  { %1601 = vrot.lane.b32.xlu1 %v2452_v33, %s2498_s4 }
0x11c0   :  { %v1602_v48 = vpop.permute.xlu1 %1601 }
0x1214   :  { %v1572_v37 = vpop.f32.mrb[18].mxu0 }
0x1215   :  { %v1576_v38 = vadd.f32 %v1572_v37, %v163_v31  ;;  %v2250_v40 = vpop.f32.mrb[19].mxu0 }
0x1217   :  { %v1577_v41 = vadd.f32 %v1576_v38, %v1576_v38 }
0x1219   :  { %v1578_v7 = vsel %vm2612_vm4, %v1577_v41, %v1576_v38 }
0x121a   :  { %v1993_v42 = vmul.f32 -1.442695, %v1578_v7 }
0x121c   :  { %2453 = vpow2.f32 %v1993_v42  ;;  %v1996_v42 = vld [vmem:[%s3051_s1 + $0x30] sm:$0xff] }
0x1226   :  { %v2454_v43 = vpop.eup %2453 }
0x1227   :  { %v1582_v6 = vadd.f32 1.0, %v2454_v43 }
0x1229   :  { %2455 = vrcp.f32 %v1582_v6 }
0x1233   :  { %v2456_v45 = vpop.eup %2455 }
0x1234   :  { %v1585_v12 = vadd.f32 %v2456_v45, %v2456_v45 }
0x1236   :  { %v1994_v47 = vadd.f32 -1.0, %v1585_v12 }
0x1238   :  { %v1587_v50 = vsel %vm2612_vm4, %v1994_v47, %v2456_v45 }
0x1239   :  { %v1604_v14 = vmul.f32 %v1602_v48, %v1587_v50  ;;  %v1588_v47 = vmul.f32 %v1587_v50, %v2897_v35 }
0x123b   :  { %1606 = vrot.lane.b32.xlu0 %v1604_v14, %s2499_s5 }
0x123f   :  { %1590 = vrot.lane.b32.xlu0 %v1587_v50, %s2498_s4 }
0x12ad   :  { %v1607_v51 = vpop.permute.xlu0 %1606 }
0x12ae   :  { %2260 = vmatmul.mubr.msk.f32.vlgmr.msra.gmra.mrb[14].mxu1 %vm193_vm5, %v1607_v51 }
0x12af   :  { %2380 = vmatpush3.bf16.msra.mxu1 %v2593_v16  ;;  %2281 = vmatprep.mubr.msk.f32.mxu1 %vm2496_vm1, %v2497_v10 }
0x12b0   :  { %2381 = vmatprep.subr.bf16.mxu1 %v2495_v4 }
0x12b1   :  { %v1591_v40 = vpop.permute.xlu0 %1590 }
0x12b2   :  { %v1593_v41 = vmul.f32 %v1591_v40, %v1587_v50 }
0x12b3   :  { %2383 = vmatpush3.bf16.msra.mxu1 %v2599_v18 }
0x1381   :  { %v1676_v11 = vpop.f32.mrb[14].mxu1 }
0x1382   :  { %v1685_v52 = vand.u32 2147483647, %v1676_v11  ;;  %v2261_v55 = vpop.f32.mrb[15].mxu1  ;;  %v1682_v10 = vmax.f32 %v1676_v11, 0.0  ;;  %vm1683_vm3 = vcmp.ne.f32.partialorder %v1676_v11, %v1676_v11  ;;  %v1680_v7 = vmax.f32 %v1676_v11, 1e-06 }
0x1384   :  { %v1686_v56 = vsub.f32 0.0, %v1685_v52  ;;  %v1681_v6 = vmin.f32 %v1680_v7, 1000000.0 }
0x1386   :  { %v1687_v62 = vmul.f32 1.442695, %v1686_v56 }
0x1388   :  { %2457 = vpow2.f32 %v1687_v62 }
0x1392   :  { %v2458_v63 = vpop.eup %2457 }
0x1393   :  { %v1689_v0 = vadd.f32 1.0, %v2458_v63  ;;  %v1692_v27 = vmul.f32 -0.5, %v2458_v63  ;;  %v1695_v32 = vand.u32 2147483647, %v2458_v63 }
0x1395   :  { %2459 = vlog2.f32 %v1689_v0  ;;  %v1693_v9 = vadd.f32 1.0, %v1692_v27  ;;  %vm1696_vm1 = vcmp.lt.f32.partialorder %v1695_v32, 0.0004427343 }
0x1397   :  { %v1694_v31 = vmul.f32 %v2458_v63, %v1693_v9 }
0x139f   :  { %v2460_v16 = vpop.eup %2459 }
0x13a0   :  { %v1691_v33 = vmul.f32 0.6931472, %v2460_v16 }
0x13a2   :  { %v1697_v4 = vsel %vm1696_vm1, %v1694_v31, %v1691_v33 }
0x13a3   :  { %v1698_v37 = vadd.f32 %v1697_v4, %v1682_v10  ;;  %v400_v4 = vsel %vm193_vm5, %v2684_v24, %v2656_v58 }
0x13a5   :  { %v2922_v18 = vsel %vm1683_vm3, %v1676_v11, %v1698_v37  ;;  %v168_v11 = vadd.f32 %v2674_v13, %v2607_v20 }
0x13a6   :  { %v1700_v38 = vmax.f32 %v2922_v18, 1e-06 }
0x13a8   :  { %1704 = vrot.lane.b32.xlu1 %v1700_v38, %s2500_s0 }
0x13ac   :  { %1595 = vrot.lane.b32.xlu1 %v1593_v41, %s2499_s5 }
0x141a   :  { %v1705_v43 = vpop.permute.xlu1 %1704 }
0x141b   :  { %v1707_v45 = vmul.f32 %v1996_v42, %v1705_v43 }
0x141d   :  { %v1708_v12 = vadd.f32 %v1707_v45, %v1681_v6 }
0x141e   :  { %v1596_v48 = vpop.permute.xlu1 %1595 }
0x141f   :  { %v2933_v14 = vadd.f32 %v1596_v48, %v1588_v47  ;;  %2271 = vmatmul.mubr.msk.f32.vlgmr.msra.gmra.mrb[20].mxu0 %vm193_vm5, %v1708_v12 }
0x1421   :  { %2461 = vtanh.f32 %v2933_v14  ;;  %v1716_v10 = vsel %vm193_vm5, %v1708_v12, %v2933_v14 }
0x142b   :  { %v2462_v51 = vpop.eup %2461 }
0x142c   :  { %1820 = vrot.lane.b32.xlu0 %v2462_v51, %s2498_s4 }
0x149e   :  { %v1821_v33 = vpop.permute.xlu0 %1820 }
0x14f2   :  { %v1791_v52 = vpop.f32.mrb[20].mxu0 }
0x14f3   :  { %v1795_v55 = vadd.f32 %v1791_v52, %v168_v11  ;;  %v2272_v56 = vpop.f32.mrb[21].mxu0 }
0x14f5   :  { %v1796_v62 = vadd.f32 %v1795_v55, %v1795_v55 }
0x14f7   :  { %v1797_v50 = vsel %vm2612_vm4, %v1796_v62, %v1795_v55 }
0x14f8   :  { %v1998_v63 = vmul.f32 -1.442695, %v1797_v50 }
0x14fa   :  { %2463 = vpow2.f32 %v1998_v63 }
0x1504   :  { %v2464_v0 = vpop.eup %2463 }
0x1505   :  { %v1801_v27 = vadd.f32 1.0, %v2464_v0 }
0x1507   :  { %2465 = vrcp.f32 %v1801_v27 }
0x1511   :  { %v2466_v9 = vpop.eup %2465 }
0x1512   :  { %v1804_v32 = vadd.f32 %v2466_v9, %v2466_v9 }
0x1514   :  { %v1999_v16 = vadd.f32 -1.0, %v1804_v32 }
0x1516   :  { %v2944_v31 = vsel %vm2612_vm4, %v1999_v16, %v2466_v9  ;;  %vm401_vm4 = vcmask 523264  }
0x1517   :  { %1809 = vrot.lane.b32.xlu0 %v2944_v31, %s2498_s4  ;;  %v1823_v20 = vmul.f32 %v1821_v33, %v2944_v31  ;;  %v2001_v33 = vld [vmem:[%s3051_s1 + $0x38] sm:$0xff] }
0x1519   :  { %1825 = vrot.lane.b32.xlu1 %v1823_v20, %s2499_s5 }
0x151b   :  { %615 = vrot.lane.b32.xlu0 %v2719_v1, %s2498_s4 }
0x151d   :  { %394 = vrot.lane.b32.xlu1 %v2681_v21, %s2498_s4 }
0x151f   :  { %1053 = vrot.lane.b32.xlu0 %v2805_v34, %s2498_s4 }
0x1521   :  { %834 = vrot.lane.b32.xlu1 %v2762_v19, %s2498_s4 }
0x1523   :  { %1491 = vrot.lane.b32.xlu0 %v2891_v5, %s2498_s4 }
0x1525   :  { %1272 = vrot.lane.b32.xlu1 %v2848_v44, %s2498_s4 }
0x1527   :  { %618 = vrot.lane.b32.xlu0 %v605_v59, %s2498_s4 }
0x1529   :  { %1710 = vrot.lane.b32.xlu1 %v1681_v6, %s2498_s4 }
0x152b   :  { %1056 = vrot.lane.b32.xlu0 %v1043_v25, %s2498_s4  ;;  %v621_v25 = vsel %vm193_vm5, %v2722_v15, %v2725_v23 }
0x152d   :  { %397 = vrot.lane.b32.xlu1 %v385_v3, %s2498_s4 }
0x1531   :  { %837 = vrot.lane.b32.xlu1 %v824_v61, %s2498_s4  ;;  %v1278_v61 = vsel %vm193_vm5, %v2851_v46, %v2854_v49  ;;  %v1059_v46 = vsel %vm193_vm5, %v2808_v36, %v2811_v39  ;;  %v840_v36 = vsel %vm193_vm5, %v2765_v26, %v2768_v30 }
0x1589   :  { %v1810_v28 = vpop.permute.xlu0 %1809 }
0x158a   :  { %v1812_v13 = vmul.f32 %v1810_v28, %v2944_v31  ;;  %v1807_v28 = vmul.f32 %v2944_v31, %v2933_v14 }
0x158b   :  { %v1826_v21 = vpop.permute.xlu1 %1825 }
0x158c   :  { %2282 = vmatmul.mubr.msk.f32.vlgmr.msra.gmra.mrb[16].mxu1 %vm193_vm5, %v1826_v21  ;;  %1814 = vrot.lane.b32.xlu0 %v1812_v13, %s2499_s5 }
0x158d   :  { %v616_v57 = vpop.permute.xlu0 %615 }
0x158e   :  { %v622_v44 = vsel %vm401_vm4, %v621_v25, %v616_v57 }
0x158f   :  { %v395_v59 = vpop.permute.xlu1 %394 }
0x1590   :  { %v402_v40 = vsel %vm401_vm4, %v400_v4, %v395_v59 }
0x1591   :  { %v1054_v1 = vpop.permute.xlu0 %1053 }
0x1592   :  { %v1060_v15 = vsel %vm401_vm4, %v1059_v46, %v1054_v1 }
0x1593   :  { %v835_v19 = vpop.permute.xlu1 %834 }
0x1594   :  { %v841_v39 = vsel %vm401_vm4, %v840_v36, %v835_v19 }
0x1595   :  { %v1492_v17 = vpop.permute.xlu0 %1491 }
0x1596   :  { %v1498_v3 = vsel %vm401_vm4, %v1497_v2, %v1492_v17 }
0x1597   :  { %v1273_v60 = vpop.permute.xlu1 %1272 }
0x1598   :  { %v2989_v34 = vsel %vm401_vm4, %v1278_v61, %v1273_v60 }
0x1599   :  { %v619_v5 = vpop.permute.xlu0 %618 }
0x159a   :  { %v623_v29 = vsel %vm403_vm6, %v622_v44, %v619_v5 }
0x159b   :  { %624 = vst [vmem:[#allocation2 + $0x8] sm:$0xff] %v623_v29  ;;  %v1711_v35 = vpop.permute.xlu1 %1710 }
0x159c   :  { %v2999_v49 = vsel %vm401_vm4, %v1716_v10, %v1711_v35 }
0x159d   :  { %v1057_v23 = vpop.permute.xlu0 %1056 }
0x159e   :  { %v1061_v37 = vsel %vm403_vm6, %v1060_v15, %v1057_v23 }
0x159f   :  { %1062 = vst [vmem:[#allocation2 + $0x18] sm:$0xff] %v1061_v37  ;;  %v398_v41 = vpop.permute.xlu1 %397 }
0x15a0   :  { %v404_v7 = vsel %vm403_vm6, %v402_v40, %v398_v41 }
0x15a1   :  { %405 = vst [vmem:[#allocation2] sm:$0xff] %v404_v7 }
0x15a3   :  { %v838_v42 = vpop.permute.xlu1 %837 }
0x15a4   :  { %v842_v43 = vsel %vm403_vm6, %v841_v39, %v838_v42 }
0x15a5   :  { %843 = vst [vmem:[#allocation2 + $0x10] sm:$0xff] %v842_v43 }
0x15fe   :  { %v1815_v53 = vpop.permute.xlu0 %1814 }
0x165f   :  { %v1895_v58 = vpop.f32.mrb[16].mxu1 }
0x1660   :  { %v1904_v24 = vand.u32 2147483647, %v1895_v58  ;;  %v2283_v6 = vpop.f32.mrb[17].mxu1  ;;  %v1899_v45 = vmax.f32 %v1895_v58, 1e-06  ;;  %v1901_v50 = vmax.f32 %v1895_v58, 0.0  ;;  %vm1902_vm8 = vcmp.ne.f32.partialorder %v1895_v58, %v1895_v58 }
0x1662   :  { %v1905_v12 = vsub.f32 0.0, %v1904_v24  ;;  %v1900_v47 = vmin.f32 %v1899_v45, 1000000.0 }
0x1664   :  { %v1906_v48 = vmul.f32 1.442695, %v1905_v12  ;;  %1929 = vrot.lane.b32.xlu0 %v1900_v47, %s2498_s4 }
0x1666   :  { %2467 = vpow2.f32 %v1906_v48 }
0x1668   :  { %1494 = vrot.lane.b32.xlu0 %v1481_v54, %s2498_s4 }
0x1670   :  { %v2468_v26 = vpop.eup %2467 }
0x1671   :  { %v1908_v30 = vadd.f32 1.0, %v2468_v26  ;;  %v1911_v51 = vmul.f32 -0.5, %v2468_v26  ;;  %v1914_v52 = vand.u32 2147483647, %v2468_v26 }
0x1673   :  { %2469 = vlog2.f32 %v1908_v30  ;;  %v1912_v11 = vadd.f32 1.0, %v1911_v51  ;;  %vm1915_vm7 = vcmp.lt.f32.partialorder %v1914_v52, 0.0004427343 }
0x1675   :  { %v1913_v62 = vmul.f32 %v2468_v26, %v1912_v11 }
0x167d   :  { %v2470_v55 = vpop.eup %2469 }
0x167e   :  { %v1910_v56 = vmul.f32 0.6931472, %v2470_v55 }
0x1680   :  { %v1916_v63 = vsel %vm1915_vm7, %v1913_v62, %v1910_v56 }
0x1681   :  { %v1917_v0 = vadd.f32 %v1916_v63, %v1901_v50 }
0x1683   :  { %v1918_v27 = vsel %vm1902_vm8, %v1895_v58, %v1917_v0 }
0x1684   :  { %v1919_v9 = vmax.f32 %v1918_v27, 1e-06 }
0x1686   :  { %1923 = vrot.lane.b32.xlu1 %v1919_v9, %s2500_s0  ;;  %1932 = vrot.lane.b32.xlu0 %v1919_v9, %s2498_s4 }
0x168a   :  { %1275 = vrot.lane.b32.xlu1 %v1262_v8, %s2498_s4  ;;  %v1817_v8 = vadd.f32 %v1815_v53, %v1807_v28 }
0x168e   :  { %1713 = vrot.lane.b32.xlu1 %v1700_v38, %s2498_s4  ;;  %s1944_s4 = sshll.u32 %s2501_s22, 4  ;;  %s1945_s4 = int_to_ptr.vmem [resolvable:$true] %s1944_s4 }
0x168f   :  { %s2471_s1 = scalar_lea.vmem %s1945_s4, 1024  ;;  %p2476_p1 = scmp.lt.s32.totalorder %s1945_s4, %s1945_s4 }
0x1690   :  { %p2472_p0 = scmp.ne.s32.totalorder %s1945_s4, %s2471_s1  ;;  %p2477_p2 = scmp.lt.s32.totalorder %s2471_s1, %s2471_s1 }
0x1692   :  { %p2478_p3 = por %p2477_p2, %p2476_p1 }
0x1694   :  { %p2479_p4 = pnand %p2478_p3, %p2472_p0 }
0x16d6   :  { %v1930_v54 = vpop.permute.xlu0 %1929 }
0x16da   :  { %v1495_v32 = vpop.permute.xlu0 %1494 }
0x16db   :  { %v1499_v16 = vsel %vm403_vm6, %v1498_v3, %v1495_v32 }
0x16dc   :  { %1500 = vst [vmem:[#allocation2 + $0x28] sm:$0xff] %v1499_v16 }
0x16f8   :  { %v1924_v20 = vpop.permute.xlu1 %1923  ;;  %v1933_v57 = vpop.permute.xlu0 %1932 }
0x16f9   :  { %v1926_v22 = vmul.f32 %v2001_v33, %v1924_v20 }
0x16fb   :  { %v1927_v13 = vadd.f32 %v1926_v22, %v1900_v47 }
0x16fc   :  { %v1276_v21 = vpop.permute.xlu1 %1275 }
0x16fd   :  { %v1935_v18 = vsel %vm193_vm5, %v1927_v13, %v1817_v8  ;;  %v1280_v38 = vsel %vm403_vm6, %v2989_v34, %v1276_v21 }
0x16fe   :  { %v1936_v59 = vsel %vm401_vm4, %v1935_v18, %v1930_v54  ;;  %1281 = vst [vmem:[#allocation2 + $0x20] sm:$0xff] %v1280_v38 }
0x16ff   :  { %v1937_v1 = vsel %vm403_vm6, %v1936_v59, %v1933_v57 }
0x1700   :  { %1938 = vst [vmem:[#allocation2 + $0x38] sm:$0xff] %v1937_v1  ;;  %v1714_v14 = vpop.permute.xlu1 %1713 }
0x1701   :  { %v1718_v31 = vsel %vm403_vm6, %v2999_v49, %v1714_v14 }
0x1702   :  { %1719 = vst [vmem:[#allocation2 + $0x30] sm:$0xff] %v1718_v31 }
0x1703   :  { %2482 = shalt.err (!%p2479_p4)
}
0x1704   :  { %s2483_s25 = scalar_lea.hbm %s3056_s6, 1024 }
0x1705   :  { %p2484_p5 = scmp.ne.s32.totalorder %s3056_s6, %s2483_s25  ;;  %p2487_p6 = scmp.lt.u32.totalorder %s2483_s25, %s3056_s6 }
0x1707   :  { %p2489_p7 = pnand %p2487_p6, %p2484_p5 }
0x1709   :  { %2492 = shalt.err (!%p2489_p7)
}
0x170a   :  { %s2502_s30 = smov 128   ;;  %s2503_s2 = smov 8  }
0x170b   :  { %1950 = dma.vmem_to_hbm [thread:$0]  %s1945_s4, 1024, %s3056_s6, [#allocation3], %s2502_s30, %s2502_s30, %s2503_s2  }
0x170c   :  { %2493 = dma.done.wait [#allocation3], 1024  }
0x170d   :  { %2494 = vsyncadd [#allocation3], 4294966272 }
0x170e   :  { %1954 = vsyncpa [#allocation3], 1 }

</bundles_post_ra>
